<compile_context>
chip_gen: v7x
topology: tpu7x:2x2x1
jax: 0.10.0
libtpu: 0.0.40
codegen_flags: <defaults>
</compile_context>

<pallas_src>
import functools

import jax
import jax.numpy as jnp
from jax import lax
from jax.experimental import pallas as pl
from jax.experimental.pallas import tpu as pltpu


def _round_up(a, b):
    return (a + b - 1) // b * b


def _downblock_kernel(x_ref, w_ref, b_ref, g_ref, be_ref, out_ref, *scratch,
                      K, W, W_out, H_out, Hp, Wp, R_act,
                      use_norm, use_pool, eps, neg_slope):
    # x_ref : (1, X_rows, C_in)   bf16  flat row-major (h*W + w) channels-last, zero padded
    # w_ref : (K*K*C_in, C_pad)   bf16  folded taps, row index = kh*K*C_in + kw*C_in + c
    # b/g/be: (1, C_pad)          f32
    # out_ref (pool=False): (1, R_act,  C_pad) f32 flat conv rows
    # out_ref (pool=True) : (1, Rp_pad, C_pad) f32 flat pooled rows (ohp*Wp + owp)
    # scratch (pool=True) : (Hp*W_pad, C_pad)  f32 staging for strided row selection
    C_pad = w_ref.shape[1]

    # ---- conv as ONE matmul: fold the K*K taps into the contraction (in-VMEM im2col) ----
    row_span = R_act + (K - 1) * W
    # kw shifts done once on the x tile (unaligned sublane slices), reused for every kh
    kwcat = jnp.concatenate(
        [x_ref[0, pl.ds(kw, row_span), :] for kw in range(K)], axis=1)   # (row_span, K*C_in)
    # kh shifts are W-aligned sublane slices of the kw-concatenated tile
    im2col = jnp.concatenate(
        [kwcat[kh * W:kh * W + R_act, :] for kh in range(K)], axis=1)    # (R_act, K*K*C_in)
    acc = jnp.dot(im2col, w_ref[...],
                  preferred_element_type=jnp.float32)                    # (R_act, C_pad) f32

    # ---- InstanceNorm2d (affine): one-pass masked per-channel statistics ----
    if use_norm:
        # validity mask over flat conv rows (p = h*W + w valid iff h < H_out and w < W_out),
        # built from iota (no mask input / DMA, no integer div/mod)
        H_cap = (R_act + W - 1) // W
        h_io = lax.broadcasted_iota(jnp.int32, (H_cap, W, C_pad), 0)
        w_io = lax.broadcasted_iota(jnp.int32, (H_cap, W, C_pad), 1)
        m = ((h_io < H_out) & (w_io < W_out)).astype(jnp.float32)
        m = m.reshape(H_cap * W, C_pad)[0:R_act, :]                      # (R_act, C_pad)

        inv_n = 1.0 / float(H_out * W_out)
        am = acc * m
        mean = jnp.sum(am, axis=0, keepdims=True) * inv_n                # (1, C_pad)
        ex2 = jnp.sum(am * acc, axis=0, keepdims=True) * inv_n
        var = jnp.maximum(ex2 - mean * mean, 0.0)                        # biased variance
        # the conv bias is exactly cancelled by the mean subtraction -> skipped (dead work)
        y = (acc - mean) * lax.rsqrt(var + eps)
        y = y * g_ref[...] + be_ref[...]
    else:
        y = acc + b_ref[...]

    # ---- LeakyReLU(0.2) ----
    act = jnp.where(y >= 0, y, neg_slope * y)                            # (R_act, C_pad) f32

    # ---- AvgPool2d(2,2) (VPU adds + strided row select) or direct dense slab store ----
    if use_pool:
        pool_s = scratch[0]
        # h-direction pair sums via aligned slab slices (rows 2j and 2j+1)
        a3 = act[0:2 * Hp * W, :].reshape(Hp, 2 * W, C_pad)
        hs = (a3[:, 0:W, :] + a3[:, W:2 * W, :]).reshape(Hp * W, C_pad)  # (Hp*W, C_pad)
        # w-direction neighbour sums; only even columns are selected below
        t = hs[0:Hp * W - 1, :] + hs[1:Hp * W, :]
        pool_s[0:Hp * W - 1, :] = t
        sel = [pool_s[pl.ds(ohp * W, Wp, stride=2)] for ohp in range(Hp)]
        pooled = 0.25 * jnp.concatenate(sel, axis=0)                     # (Hp*Wp, C_pad)
        out_ref[0, 0:Hp * Wp, :] = pooled.astype(out_ref.dtype)          # single store
    else:
        out_ref[0] = act.astype(out_ref.dtype)                           # single dense store


def downblock_disc(x, weight, bias, gamma=None, beta=None, *,
                   norm=False, pool=False, sn=False, eps=1e-5):
    """x: (N, C_in, H, W) f32. weight: (C_out, C_in, K, K). Returns NCHW f32."""
    N, C_in, H, W = x.shape
    C_out, _, K, _ = weight.shape
    H_out, W_out = H - K + 1, W - K + 1
    Hp, Wp = (H_out // 2, W_out // 2) if pool else (H_out, W_out)

    C_pad = _round_up(C_out, 128)                 # lane-dense output channels
    R = H_out * W                                 # flat conv rows (valid where p % W < W_out)
    R_act = _round_up(R, 8)
    X_rows = _round_up(R_act + (K - 1) * (W + 1), 8)

    w = weight.astype(jnp.float32)
    if sn:
        # eval-time spectral norm: exact largest singular value (PyTorch uses power iteration)
        sigma = jnp.linalg.svd(w.reshape(C_out, -1), compute_uv=False)[0]
        w = w / sigma

    # flat channels-last input, zero-padded rows, bf16 (half the DMA bytes, feeds bf16 MXU)
    # TODO(synk): fold this transpose/pad/cast pre-pass into the kernel (extra HBM round trip).
    x_flat = jnp.transpose(x, (0, 2, 3, 1)).reshape(N, H * W, C_in)
    x_flat = jnp.pad(x_flat, ((0, 0), (0, X_rows - H * W), (0, 0))).astype(jnp.bfloat16)

    # folded conv weights: rows ordered (kh, kw, c_in); output channels zero-padded to C_pad
    w_fold = jnp.transpose(w, (2, 3, 1, 0)).reshape(K * K * C_in, C_out)
    w_fold = jnp.pad(w_fold, ((0, 0), (0, C_pad - C_out))).astype(jnp.bfloat16)

    def _row(v, default):
        v = default if v is None else v
        return jnp.pad(v.astype(jnp.float32).reshape(1, C_out),
                       ((0, 0), (0, C_pad - C_out)))

    b_row = _row(bias, jnp.zeros((C_out,), jnp.float32))
    g_row = _row(gamma, jnp.ones((C_out,), jnp.float32))
    be_row = _row(beta, jnp.zeros((C_out,), jnp.float32))

    if pool:
        out_rows = _round_up(Hp * Wp, 8)
        scratch_shapes = [pltpu.VMEM((_round_up(Hp * W, 8), C_pad), jnp.float32)]
    else:
        out_rows = R_act
        scratch_shapes = []

    kernel = functools.partial(
        _downblock_kernel, K=K, W=W, W_out=W_out, H_out=H_out, Hp=Hp, Wp=Wp,
        R_act=R_act, use_norm=norm, use_pool=pool, eps=eps, neg_slope=0.2)

    out = pl.pallas_call(
        kernel,
        out_shape=jax.ShapeDtypeStruct((N, out_rows, C_pad), jnp.float32),
        grid=(N,),
        in_specs=[
            pl.BlockSpec((1, X_rows, C_in), lambda i: (i, 0, 0)),       # one sample per step
            pl.BlockSpec((K * K * C_in, C_pad), lambda i: (0, 0)),      # folded conv weights
            pl.BlockSpec((1, C_pad), lambda i: (0, 0)),                 # bias
            pl.BlockSpec((1, C_pad), lambda i: (0, 0)),                 # instance-norm gamma
            pl.BlockSpec((1, C_pad), lambda i: (0, 0)),                 # instance-norm beta
        ],
        out_specs=pl.BlockSpec((1, out_rows, C_pad), lambda i: (i, 0, 0)),
        scratch_shapes=scratch_shapes,
        compiler_params=pltpu.CompilerParams(dimension_semantics=("parallel",)),
    )(x_flat, w_fold, b_row, g_row, be_row)

    # epilogue: slice the channel padding BEFORE transposing (16x less data moved)
    if pool:
        y = out[:, :Hp * Wp, :C_out].reshape(N, Hp, Wp, C_out)
    else:
        y = out[:, :R, :C_out].reshape(N, H_out, W, C_out)[:, :, :W_out, :]
    return jnp.transpose(y, (0, 3, 1, 2))


def _reference(x, weight, bias, gamma, beta, *, norm, pool, eps=1e-5):
    """Pure-JAX f32 reference mirroring the PyTorch forward (NCHW)."""
    y = lax.conv_general_dilated(x, weight, (1, 1), 'VALID',
                                 dimension_numbers=('NCHW', 'OIHW', 'NCHW'))
    y = y + bias.reshape(1, -1, 1, 1)
    if norm:
        m = y.mean(axis=(2, 3), keepdims=True)
        v = ((y - m) ** 2).mean(axis=(2, 3), keepdims=True)
        y = (y - m) / jnp.sqrt(v + eps)
        y = y * gamma.reshape(1, -1, 1, 1) + beta.reshape(1, -1, 1, 1)
    y = jnp.where(y >= 0, y, 0.2 * y)
    if pool:
        n, c, ho, wo = y.shape
        hp, wp = ho // 2, wo // 2
        y = y[:, :, :2 * hp, :2 * wp].reshape(n, c, hp, 2, wp, 2).mean(axis=(3, 5))
    return y


if __name__ == "__main__":
    key = jax.random.PRNGKey(0)
    k_x, k_w, k_b, k_g, k_be = jax.random.split(key, 5)

    N, C_in, H, W = 2, 4, 16, 16
    C_out, K = 8, 4

    x = jax.random.normal(k_x, (N, C_in, H, W), jnp.float32)
    weight = jax.random.normal(k_w, (C_out, C_in, K, K), jnp.float32) * 0.1
    bias = jax.random.normal(k_b, (C_out,), jnp.float32) * 0.1
    gamma = 1.0 + 0.1 * jax.random.normal(k_g, (C_out,), jnp.float32)
    beta = 0.1 * jax.random.normal(k_be, (C_out,), jnp.float32)

    # full path: conv -> InstanceNorm -> LeakyReLU -> AvgPool
    out = downblock_disc(x, weight, bias, gamma, beta, norm=True, pool=True)
    out = jax.block_until_ready(out)
    ref = _reference(x, weight, bias, gamma, beta, norm=True, pool=True)
    assert out.shape == ref.shape, (out.shape, ref.shape)
    err = float(jnp.max(jnp.abs(out - ref)))
    assert err < 5e-2, err   # bf16 matmul operands -> loosened tolerance (intentional)

    # module-default path: conv -> LeakyReLU (norm=False, pool=False)
    out2 = downblock_disc(x, weight, bias, None, None, norm=False, pool=False)
    out2 = jax.block_until_ready(out2)
    ref2 = _reference(x, weight, bias, gamma, beta, norm=False, pool=False)
    assert out2.shape == ref2.shape, (out2.shape, ref2.shape)
    err2 = float(jnp.max(jnp.abs(out2 - ref2)))
    assert err2 < 5e-2, err2

    print("KERNEL_OK")
</pallas_src>

<mosaic_0001>
module attributes {stable_mosaic.version = 11 : i64} {
  func.func @_downblock_kernel(%arg0: i32, %arg1: memref<1x264x4xbf16, #tpu.memory_space<vmem>>, %arg2: memref<64x128xbf16, #tpu.memory_space<vmem>>, %arg3: memref<1x128xf32, #tpu.memory_space<vmem>>, %arg4: memref<1x128xf32, #tpu.memory_space<vmem>>, %arg5: memref<1x128xf32, #tpu.memory_space<vmem>>, %arg6: memref<1x40x128xf32, #tpu.memory_space<vmem>>, %arg7: memref<96x128xf32, #tpu.memory_space<vmem>>) attributes {dimension_semantics = [#tpu.dimension_semantics<parallel>], iteration_bounds = array<i64: 2>, scalar_prefetch = 0 : i64, scratch_operands = 1 : i64, tpu.core_type = #tpu.core_type<tc>, window_params = [{transform_indices = @transform_0, window_bounds = array<i64: 1, 264, 4>}, {pipeline_mode = #tpu.pipeline_mode<synchronous>, transform_indices = @transform_1, window_bounds = array<i64: 64, 128>}, {pipeline_mode = #tpu.pipeline_mode<synchronous>, transform_indices = @transform_2, window_bounds = array<i64: 1, 128>}, {pipeline_mode = #tpu.pipeline_mode<synchronous>, transform_indices = @transform_3, window_bounds = array<i64: 1, 128>}, {pipeline_mode = #tpu.pipeline_mode<synchronous>, transform_indices = @transform_4, window_bounds = array<i64: 1, 128>}, {transform_indices = @transform_5, window_bounds = array<i64: 1, 40, 128>}]} {
    %c0 = arith.constant 0 : index
    %c0_0 = arith.constant 0 : index
    %c0_1 = arith.constant 0 : index
    %0 = vector.load %arg1[%c0, %c0_0, %c0_1] : memref<1x264x4xbf16, #tpu.memory_space<vmem>>, vector<1x256x4xbf16>
    %1 = vector.shape_cast %0 : vector<1x256x4xbf16> to vector<256x4xbf16>
    %c0_2 = arith.constant 0 : index
    %c1 = arith.constant 1 : index
    %c0_3 = arith.constant 0 : index
    %2 = vector.load %arg1[%c0_2, %c1, %c0_3] : memref<1x264x4xbf16, #tpu.memory_space<vmem>>, vector<1x256x4xbf16>
    %3 = vector.shape_cast %2 : vector<1x256x4xbf16> to vector<256x4xbf16>
    %c0_4 = arith.constant 0 : index
    %c2 = arith.constant 2 : index
    %c0_5 = arith.constant 0 : index
    %4 = vector.load %arg1[%c0_4, %c2, %c0_5] : memref<1x264x4xbf16, #tpu.memory_space<vmem>>, vector<1x256x4xbf16>
    %5 = vector.shape_cast %4 : vector<1x256x4xbf16> to vector<256x4xbf16>
    %c0_6 = arith.constant 0 : index
    %c3 = arith.constant 3 : index
    %c0_7 = arith.constant 0 : index
    %6 = vector.load %arg1[%c0_6, %c3, %c0_7] : memref<1x264x4xbf16, #tpu.memory_space<vmem>>, vector<1x256x4xbf16>
    %7 = vector.shape_cast %6 : vector<1x256x4xbf16> to vector<256x4xbf16>
    %8 = tpu.concatenate %1, %3, %5, %7 in 1 : vector<256x4xbf16>, vector<256x4xbf16>, vector<256x4xbf16>, vector<256x4xbf16> -> vector<256x16xbf16>
    %9 = vector.extract_strided_slice %8 {offsets = [0, 0], sizes = [208, 16], strides = [1, 1]} : vector<256x16xbf16> to vector<208x16xbf16>
    %10 = vector.extract_strided_slice %8 {offsets = [16, 0], sizes = [208, 16], strides = [1, 1]} : vector<256x16xbf16> to vector<208x16xbf16>
    %11 = vector.extract_strided_slice %8 {offsets = [32, 0], sizes = [208, 16], strides = [1, 1]} : vector<256x16xbf16> to vector<208x16xbf16>
    %12 = vector.extract_strided_slice %8 {offsets = [48, 0], sizes = [208, 16], strides = [1, 1]} : vector<256x16xbf16> to vector<208x16xbf16>
    %13 = tpu.concatenate %9, %10, %11, %12 in 1 : vector<208x16xbf16>, vector<208x16xbf16>, vector<208x16xbf16>, vector<208x16xbf16> -> vector<208x64xbf16>
    %c0_8 = arith.constant 0 : index
    %c0_9 = arith.constant 0 : index
    %14 = vector.load %arg2[%c0_8, %c0_9] : memref<64x128xbf16, #tpu.memory_space<vmem>>, vector<64x128xbf16>
    %cst = arith.constant dense<0.000000e+00> : vector<208x128xf32>
    %15 = tpu.matmul %13, %14, %cst {dimension_numbers = #tpu.dot_dimension_numbers<[1], [0], [0], [1], [0, 0, 1, 1], [], []>} : vector<208x64xbf16>, vector<64x128xbf16>, vector<208x128xf32> -> vector<208x128xf32>
    %16 = tpu.iota {dimensions = array<i32: 0>} : vector<13x16x128xi32>
    %17 = tpu.iota {dimensions = array<i32: 1>} : vector<13x16x128xi32>
    %c13_i32 = arith.constant 13 : i32
    %18 = vector.broadcast %c13_i32 : i32 to vector<13x16x128xi32>
    %19 = arith.cmpi slt, %16, %18 : vector<13x16x128xi32>
    %c13_i32_10 = arith.constant 13 : i32
    %20 = vector.broadcast %c13_i32_10 : i32 to vector<13x16x128xi32>
    %21 = arith.cmpi slt, %17, %20 : vector<13x16x128xi32>
    %22 = arith.andi %19, %21 : vector<13x16x128xi1>
    %23 = arith.extui %22 : vector<13x16x128xi1> to vector<13x16x128xi32>
    %24 = arith.sitofp %23 : vector<13x16x128xi32> to vector<13x16x128xf32>
    %25 = vector.shape_cast %24 : vector<13x16x128xf32> to vector<208x128xf32>
    %26 = arith.mulf %15, %25 : vector<208x128xf32>
    %cst_11 = arith.constant dense<0.000000e+00> : vector<128xf32>
    %27 = vector.multi_reduction <add>, %26, %cst_11 [0] : vector<208x128xf32> to vector<128xf32>
    %28 = vector.shape_cast %27 : vector<128xf32> to vector<1x128xf32>
    %cst_12 = arith.constant 5.917160e-03 : f32
    %29 = vector.broadcast %cst_12 : f32 to vector<1x128xf32>
    %30 = arith.mulf %28, %29 : vector<1x128xf32>
    %31 = arith.mulf %26, %15 : vector<208x128xf32>
    %cst_13 = arith.constant dense<0.000000e+00> : vector<128xf32>
    %32 = vector.multi_reduction <add>, %31, %cst_13 [0] : vector<208x128xf32> to vector<128xf32>
    %33 = vector.shape_cast %32 : vector<128xf32> to vector<1x128xf32>
    %cst_14 = arith.constant 5.917160e-03 : f32
    %34 = vector.broadcast %cst_14 : f32 to vector<1x128xf32>
    %35 = arith.mulf %33, %34 : vector<1x128xf32>
    %36 = arith.mulf %30, %30 : vector<1x128xf32>
    %37 = arith.subf %35, %36 : vector<1x128xf32>
    %cst_15 = arith.constant 0.000000e+00 : f32
    %38 = vector.broadcast %cst_15 : f32 to vector<1x128xf32>
    %39 = arith.maximumf %37, %38 : vector<1x128xf32>
    %40 = vector.broadcast %30 : vector<1x128xf32> to vector<208x128xf32>
    %41 = arith.subf %15, %40 : vector<208x128xf32>
    %cst_16 = arith.constant 9.99999974E-6 : f32
    %42 = vector.broadcast %cst_16 : f32 to vector<1x128xf32>
    %43 = arith.addf %39, %42 : vector<1x128xf32>
    %44 = math.rsqrt %43 : vector<1x128xf32>
    %45 = vector.broadcast %44 : vector<1x128xf32> to vector<208x128xf32>
    %46 = arith.mulf %41, %45 : vector<208x128xf32>
    %c0_17 = arith.constant 0 : index
    %c0_18 = arith.constant 0 : index
    %47 = vector.load %arg4[%c0_17, %c0_18] : memref<1x128xf32, #tpu.memory_space<vmem>>, vector<1x128xf32>
    %48 = vector.broadcast %47 : vector<1x128xf32> to vector<208x128xf32>
    %49 = arith.mulf %46, %48 : vector<208x128xf32>
    %c0_19 = arith.constant 0 : index
    %c0_20 = arith.constant 0 : index
    %50 = vector.load %arg5[%c0_19, %c0_20] : memref<1x128xf32, #tpu.memory_space<vmem>>, vector<1x128xf32>
    %51 = vector.broadcast %50 : vector<1x128xf32> to vector<208x128xf32>
    %52 = arith.addf %49, %51 : vector<208x128xf32>
    %cst_21 = arith.constant 0.000000e+00 : f32
    %53 = vector.broadcast %cst_21 : f32 to vector<208x128xf32>
    %54 = arith.cmpf oge, %52, %53 : vector<208x128xf32>
    %cst_22 = arith.constant 2.000000e-01 : f32
    %55 = vector.broadcast %cst_22 : f32 to vector<208x128xf32>
    %56 = arith.mulf %55, %52 : vector<208x128xf32>
    %57 = arith.select %54, %52, %56 : vector<208x128xi1>, vector<208x128xf32>
    %58 = vector.extract_strided_slice %57 {offsets = [0, 0], sizes = [192, 128], strides = [1, 1]} : vector<208x128xf32> to vector<192x128xf32>
    %59 = vector.shape_cast %58 : vector<192x128xf32> to vector<6x32x128xf32>
    %60 = vector.extract_strided_slice %59 {offsets = [0, 0, 0], sizes = [6, 16, 128], strides = [1, 1, 1]} : vector<6x32x128xf32> to vector<6x16x128xf32>
    %61 = vector.extract_strided_slice %59 {offsets = [0, 16, 0], sizes = [6, 16, 128], strides = [1, 1, 1]} : vector<6x32x128xf32> to vector<6x16x128xf32>
    %62 = arith.addf %60, %61 : vector<6x16x128xf32>
    %63 = vector.shape_cast %62 : vector<6x16x128xf32> to vector<96x128xf32>
    %64 = vector.extract_strided_slice %63 {offsets = [0, 0], sizes = [95, 128], strides = [1, 1]} : vector<96x128xf32> to vector<95x128xf32>
    %65 = vector.extract_strided_slice %63 {offsets = [1, 0], sizes = [95, 128], strides = [1, 1]} : vector<96x128xf32> to vector<95x128xf32>
    %66 = arith.addf %64, %65 : vector<95x128xf32>
    %c0_23 = arith.constant 0 : index
    %c0_24 = arith.constant 0 : index
    %67 = vector.load %arg7[%c0_23, %c0_24] : memref<96x128xf32, #tpu.memory_space<vmem>>, vector<95x128xf32>
    tpu.vector_store %arg7[%c0_23, %c0_24], %66 {strides = array<i32>} : memref<96x128xf32, #tpu.memory_space<vmem>>, vector<95x128xf32>,
    %c0_25 = arith.constant 0 : index
    %c0_26 = arith.constant 0 : index
    %68 = tpu.strided_load %arg7[%c0_25, %c0_26] {strides = array<i32: 2, 1>} : memref<96x128xf32, #tpu.memory_space<vmem>>, vector<6x128xf32>
    %c16 = arith.constant 16 : index
    %c0_27 = arith.constant 0 : index
    %69 = tpu.strided_load %arg7[%c16, %c0_27] {strides = array<i32: 2, 1>} : memref<96x128xf32, #tpu.memory_space<vmem>>, vector<6x128xf32>
    %c32 = arith.constant 32 : index
    %c0_28 = arith.constant 0 : index
    %70 = tpu.strided_load %arg7[%c32, %c0_28] {strides = array<i32: 2, 1>} : memref<96x128xf32, #tpu.memory_space<vmem>>, vector<6x128xf32>
    %c48 = arith.constant 48 : index
    %c0_29 = arith.constant 0 : index
    %71 = tpu.strided_load %arg7[%c48, %c0_29] {strides = array<i32: 2, 1>} : memref<96x128xf32, #tpu.memory_space<vmem>>, vector<6x128xf32>
    %c64 = arith.constant 64 : index
    %c0_30 = arith.constant 0 : index
    %72 = tpu.strided_load %arg7[%c64, %c0_30] {strides = array<i32: 2, 1>} : memref<96x128xf32, #tpu.memory_space<vmem>>, vector<6x128xf32>
    %c80 = arith.constant 80 : index
    %c0_31 = arith.constant 0 : index
    %73 = tpu.strided_load %arg7[%c80, %c0_31] {strides = array<i32: 2, 1>} : memref<96x128xf32, #tpu.memory_space<vmem>>, vector<6x128xf32>
    %74 = tpu.concatenate %68, %69, %70, %71, %72, %73 in 0 : vector<6x128xf32>, vector<6x128xf32>, vector<6x128xf32>, vector<6x128xf32>, vector<6x128xf32>, vector<6x128xf32> -> vector<36x128xf32>
    %cst_32 = arith.constant 2.500000e-01 : f32
    %75 = vector.broadcast %cst_32 : f32 to vector<36x128xf32>
    %76 = arith.mulf %75, %74 : vector<36x128xf32>
    %c0_33 = arith.constant 0 : index
    %c0_34 = arith.constant 0 : index
    %c0_35 = arith.constant 0 : index
    %77 = vector.load %arg6[%c0_33, %c0_34, %c0_35] : memref<1x40x128xf32, #tpu.memory_space<vmem>>, vector<1x36x128xf32>
    %78 = vector.shape_cast %77 : vector<1x36x128xf32> to vector<36x128xf32>
    %79 = vector.shape_cast %76 : vector<36x128xf32> to vector<1x36x128xf32>
    tpu.vector_store %arg6[%c0_33, %c0_34, %c0_35], %79 {strides = array<i32>} : memref<1x40x128xf32, #tpu.memory_space<vmem>>, vector<1x36x128xf32>,
    return
  }
  func.func @transform_0(%arg0: i32) -> (i32, i32, i32) {
    %c0_i32 = arith.constant 0 : i32
    %c0_i32_0 = arith.constant 0 : i32
    %c0_i32_1 = arith.constant 0 : i32
    return %arg0, %c0_i32, %c0_i32_0 : i32, i32, i32
  }
  func.func @transform_1(%arg0: i32) -> (i32, i32) {
    %c0_i32 = arith.constant 0 : i32
    %c0_i32_0 = arith.constant 0 : i32
    %c0_i32_1 = arith.constant 0 : i32
    return %c0_i32, %c0_i32_0 : i32, i32
  }
  func.func @transform_2(%arg0: i32) -> (i32, i32) {
    %c0_i32 = arith.constant 0 : i32
    %c0_i32_0 = arith.constant 0 : i32
    %c0_i32_1 = arith.constant 0 : i32
    return %c0_i32, %c0_i32_0 : i32, i32
  }
  func.func @transform_3(%arg0: i32) -> (i32, i32) {
    %c0_i32 = arith.constant 0 : i32
    %c0_i32_0 = arith.constant 0 : i32
    %c0_i32_1 = arith.constant 0 : i32
    return %c0_i32, %c0_i32_0 : i32, i32
  }
  func.func @transform_4(%arg0: i32) -> (i32, i32) {
    %c0_i32 = arith.constant 0 : i32
    %c0_i32_0 = arith.constant 0 : i32
    %c0_i32_1 = arith.constant 0 : i32
    return %c0_i32, %c0_i32_0 : i32, i32
  }
  func.func @transform_5(%arg0: i32) -> (i32, i32, i32) {
    %c0_i32 = arith.constant 0 : i32
    %c0_i32_0 = arith.constant 0 : i32
    %c0_i32_1 = arith.constant 0 : i32
    return %arg0, %c0_i32, %c0_i32_0 : i32, i32, i32
  }
}

</mosaic_0001>

<bundles_post_ra>
// kernel: tpu_custom_call.1
= control target key start
LH: loop header
LB: loop body
LE: loop exit
PB: predicated region body
PF: predicated region fallthrough
CT: control target
= control target key end

     0   :  { %10 = vsyncpa [#allocation4], 0  ;;  %s2942_s0 = inlined_call_operand.vmem [shape: bf16[2,264,4], index: 0, kind: input, shape index: {}]   ;;  %s2943_s1 = inlined_call_operand.vmem [shape: bf16[64,128], index: 1, kind: input, shape index: {}]   ;;  %s2944_s2 = inlined_call_operand.vmem [shape: f32[1,128], index: 2, kind: input, shape index: {}]   ;;  %s2945_s3 = inlined_call_operand.vmem [shape: f32[1,128], index: 3, kind: input, shape index: {}]   ;;  %s2946_s4 = inlined_call_operand.vmem [shape: f32[1,128], index: 4, kind: input, shape index: {}]   ;;  %s2947_s5 = inlined_call_operand.hbm [shape: f32[2,40,128], index: 5, kind: output, shape index: {}]  }
   0x1   :  { %12 = vsyncpa [#allocation4 + $0x1], 0  ;;  %s1984_s18 = smov 0   ;;  %s1986_s19 = smov 0  }
   0x2   :  { %s1988_s20 = smov 0   ;;  %s1990_s21 = smov 0  }
   0x3 LB: > { %s2005_s2 = sadd.s32 4294967295, %s1942_s21   ;;  %s1672_s22 = sadd.s32 4294967294, %s1942_s21   ;;  %s1942_s21 = sphi %s1990_s21, %s2973_s21   ;;  %s1938_s20 = sphi %s1988_s20, %s2972_s20   ;;  %s1934_s19 = sphi %s1986_s19, %s2971_s19   ;;  %s1930_s18 = sphi %s1984_s18, %s2970_s18  }
   0x4   : > { %s2009_s23 = sadd.s32 1, %s1942_s21   ;;  %s135_s24 = sadd.s32 1, %s1938_s20 }
   0x5   : > { %s132_s25 = ssub.s32 %s1942_s21, %s2009_s23  ;;  %p145_p0 = scmp.ne.s32.totalorder %s1938_s20, %s1934_s19 }
   0x6   : > { %p133_p1 = scmp.eq.s32.totalorder %s132_s25, 0  ;;  %p146_p2 = scmp.eq.s32.totalorder %s2005_s2, 1 }
   0x7   : > { %p151_p3 = scmp.ne.s32.totalorder %s1934_s19, %s1930_s18  ;;  %p152_p4 = scmp.eq.s32.totalorder %s1672_s22, 1 }
   0x8   : > { %s2020_s26 = scalar_select %p133_p1, %s1938_s20, %s135_s24  }
   0x9   : > { %p2022_p5 = por %p146_p2, %p145_p0  ;;  %p2026_p6 = por %p152_p4, %p151_p3 }
   0xa   : > { %p1675_p7 = scmp.ge.s32.totalorder %s1942_s21, 1  ;;  %p190_p8 = scmp.lt.s32.totalorder %s1942_s21, 3 }
   0xc   : > { %p191_p9 = pnand %p1675_p7, %p190_p8 }
   0xd   : > { %p218_p10 = scmp.lt.s32.totalorder (!%p191_p9), %s2005_s2, 1  ;;  %vm2948_vm0 = vcmask (!%p191_p9), 1046528   ;;  %vm342_vm1 = vsmask.f32 (!%p191_p9), 7424  ;;  %vm579_vm2 = vsmask.f32 (!%p191_p9), 6400 }
   0xe   : > { %194 = sbr.rel (%p191_p9) target bundleno = 700 (0x2bc), region = 40  ;;  %s1944_s9 = smov (!%p191_p9), 8   ;;  %vm1948_vm3 = vmmov (!%p191_p9), 0   ;;  %vm689_vm4 = vcmask (!%p191_p9), 31744   ;;  %vm755_vm5 = vcmask (!%p191_p9), 97280   ;;  %vm722_vm6 = vcmask (!%p191_p9), 64512  }
   0xf   : > { %s1945_s10 = smov (!%p191_p9), 4   ;;  %s1946_s11 = smov (!%p191_p9), 12   ;;  %vm881_vm7 = vcmask (!%p191_p9), 130048   ;;  %vm908_vm8 = vcmask (!%p191_p9), 261120   ;;  %vm935_vm9 = vcmask (!%p191_p9), 392192   ;;  %vm994_vm10 = vcmask (!%p191_p9), 523264  }
  0x10   : > { %s1949_s25 = smov (!%p191_p9), 16   ;;  %s1806_s13 = smul.u32 (!%p191_p9), 640, %s2005_s2 }
  0x12   : > { %s2894_s17 = scalar_lea.hbm (!%p191_p9), %s2947_s5, %s1806_s13 }
  0x15   : > { %s219_s29 = scalar_select %p218_p10, %s2005_s2, 1 }
  0x17   : > { %s1805_s30 = smul.u32 132, %s219_s29  ;;  %s1950_s29 = smov 32  }
  0x19   : > { %s2037_s8 = scalar_lea.vmem %s2942_s0, %s1805_s30  ;;  %s1951_s30 = smov 48  }
  0x1a   : > { %v2040_v0 = vld [vmem:[%s2037_s8 + $0x10] sm:$0xff]   ;;  %v2043_v1 = vld [vmem:[%s2037_s8 + $0x18] sm:$0xff]   ;;  %v2046_v2 = vld [vmem:[%s2037_s8 + $0x8] sm:$0xff]  }
  0x1b   : > { %v514_v3 = vrot.slane %v2040_v0, 1  ;;  %v516_v4 = vrot.slane %v2043_v1, 1  ;;  %v512_v5 = vrot.slane %v2046_v2, 1  ;;  %v2052_v6 = vld [vmem:[%s2037_s8 + $0x20] sm:$0xff]   ;;  %v367_v7 = vshll.u32 %v2043_v1, 16  ;;  %v2068_v18 = vld [vmem:[%s2037_s8 + $0x28] sm:$0xff]  }
  0x1c   : > { %v371_v8 = vshrl.u32 %v2043_v1, 16  ;;  %v351_v9 = vshll.u32 %v2046_v2, 16  ;;  %v355_v11 = vshrl.u32 %v2046_v2, 16  ;;  %v359_v12 = vshll.u32 %v2040_v0, 16  ;;  %v2090_v46 = vld [vmem:[%s2037_s8 + $0x30] sm:$0xff]   ;;  %v2101_v57 = vld [vmem:[%s2037_s8 + $0x38] sm:$0xff]  }
  0x1d   : > { %v517_v10 = vsel %vm2948_vm0, %v514_v3, %v516_v4  ;;  %v363_v13 = vshrl.u32 %v2040_v0, 16  ;;  %v515_v14 = vsel %vm2948_vm0, %v512_v5, %v514_v3  ;;  %v518_v15 = vrot.slane %v2052_v6, 1  ;;  %v2106_v60 = vld [vmem:[%s2037_s8 + $0x48] sm:$0xff]  }
  0x1e   : > { %548 = vrot.lane.b32.xlu0 %v517_v10, %s1944_s9  ;;  %v369_v16 = vrot.slane %v367_v7, 1  ;;  %v375_v17 = vshll.u32 %v2052_v6, 16  ;;  %546 = vrot.lane.b32.xlu1 %v515_v14, %s1944_s9  ;;  %v588_v19 = vrot.slane %v355_v11, 1  ;;  %v589_v20 = vrot.slane %v351_v9, 2  ;;  %v2122_v14 = vld [vmem:[%s2037_s8 + $0x50] sm:$0xff]  }
  0x1f   : > { %v592_v21 = vrot.slane %v363_v13, 1  ;;  %v593_v22 = vrot.slane %v359_v12, 2  ;;  %v519_v23 = vsel %vm2948_vm0, %v516_v4, %v518_v15  ;;  %v2072_v26 = vrot.slane %v351_v9, 1  ;;  %v2111_v4 = vld [vmem:[%s2037_s8 + $0x40] sm:$0xff]  }
  0x20   : > { %v373_v24 = vor.u32 %v371_v8, %v369_v16  ;;  %v377_v25 = vrot.slane %v375_v17, 1  ;;  %v2074_v27 = vor.u32 %v589_v20, %v588_v19  ;;  %v361_v29 = vrot.slane %v359_v12, 1 }
  0x21   : > { %v594_v28 = vor.u32 %v593_v22, %v592_v21  ;;  %v596_v30 = vrot.slane %v371_v8, 1  ;;  %v357_v32 = vor.u32 %v355_v11, %v2072_v26  ;;  %v597_v33 = vrot.slane %v367_v7, 2 }
  0x22   : > { %550 = vrot.lane.b32.xlu0 %v519_v23, %s1944_s9  ;;  %v378_v31 = vsel %vm342_vm1, %v373_v24, %v377_v25  ;;  %v379_v34 = vshrl.u32 %v2052_v6, 16  ;;  %v365_v35 = vor.u32 %v363_v13, %v361_v29  ;;  %v383_v36 = vshll.u32 %v2068_v18, 16 }
  0x23   : > { %481 = vrot.lane.b32.xlu1 %v378_v31, %s1945_s10  ;;  %v601_v37 = vrot.slane %v375_v17, 2  ;;  %v595_v38 = vsel %vm579_vm2, %v2074_v27, %v594_v28  ;;  %v362_v39 = vsel %vm342_vm1, %v357_v32, %v361_v29  ;;  %v598_v40 = vor.u32 %v597_v33, %v596_v30  ;;  %v2136_v32 = vld [vmem:[%s2037_s8 + $0x58] sm:$0xff]  }
  0x24   : > { %v600_v41 = vrot.slane %v379_v34, 1  ;;  %v387_v42 = vshrl.u32 %v2068_v18, 16  ;;  %v370_v43 = vsel %vm342_vm1, %v365_v35, %v369_v16  ;;  %v385_v44 = vrot.slane %v383_v36, 1  ;;  %v224_v35 = vld [vmem:[%s2037_s8] sm:$0xf] }
  0x25   : > { %v599_v47 = vsel %vm579_vm2, %v594_v28, %v598_v40  ;;  %v381_v48 = vor.u32 %v379_v34, %v377_v25  ;;  %v605_v50 = vrot.slane %v383_v36, 2  ;;  %v520_v52 = vrot.slane %v2068_v18, 1 }
  0x26   : > { %477 = vrot.lane.b32.xlu0 %v362_v39, %s1945_s10  ;;  %v602_v45 = vor.u32 %v601_v37, %v600_v41  ;;  %v604_v49 = vrot.slane %v387_v42, 1  ;;  %v391_v53 = vshll.u32 %v2090_v46, 16  ;;  %v395_v54 = vshrl.u32 %v2090_v46, 16  ;;  %v257_v41 = vld [vmem:[%s2037_s8] sm:$0xe] }
  0x27   : > { %659 = vrot.lane.b32.xlu1 %v595_v38, %s1946_s11  ;;  %v386_v55 = vsel %vm342_vm1, %v381_v48, %v385_v44  ;;  %v522_v58 = vrot.slane %v2090_v46, 1  ;;  %v389_v59 = vor.u32 %v387_v42, %v385_v44  ;;  %v521_v61 = vsel %vm2948_vm0, %v518_v15, %v520_v52 }
  0x28   : > { %v603_v51 = vsel %vm579_vm2, %v598_v40, %v602_v45  ;;  %v606_v56 = vor.u32 %v605_v50, %v604_v49  ;;  %v393_v62 = vrot.slane %v391_v53, 1  ;;  %v608_v63 = vrot.slane %v395_v54, 1  ;;  %v225_v40 = vld [vmem:[%s2037_s8 + $0x4] sm:$0xf]  ;;  %v2157_v50 = vld [vmem:[%s2037_s8 + $0x78] sm:$0xff]  }
  0x29   : > { %v609_v3 = vrot.slane %v391_v53, 2  ;;  %v399_v8 = vshll.u32 %v2101_v57, 16  ;;  %v403_v9 = vshrl.u32 %v2101_v57, 16  ;;  %v415_v10 = vshll.u32 %v2106_v60, 16 }
  0x2a   : > { %479 = vrot.lane.b32.xlu0 %v370_v43, %s1945_s10  ;;  %v607_v7 = vsel %vm579_vm2, %v602_v45, %v606_v56  ;;  %v523_v11 = vsel %vm2948_vm0, %v520_v52, %v522_v58  ;;  %v394_v12 = vsel %vm342_vm1, %v389_v59, %v393_v62  ;;  %v407_v15 = vshll.u32 %v2111_v4, 16 }
  0x2b   : > { %661 = vrot.lane.b32.xlu1 %v599_v47, %s1946_s11  ;;  %v610_v13 = vor.u32 %v609_v3, %v608_v63  ;;  %v397_v16 = vor.u32 %v395_v54, %v393_v62  ;;  %v401_v17 = vrot.slane %v399_v8, 1  ;;  %v612_v19 = vrot.slane %v403_v9, 1 }
  0x2c   : > { %v613_v20 = vrot.slane %v399_v8, 2  ;;  %v524_v21 = vrot.slane %v2101_v57, 1  ;;  %v417_v22 = vrot.slane %v415_v10, 1  ;;  %v419_v23 = vshrl.u32 %v2106_v60, 16 }
  0x2d   : > { %v611_v24 = vsel %vm579_vm2, %v606_v56, %v610_v13  ;;  %v423_v25 = vshll.u32 %v2122_v14, 16  ;;  %v409_v28 = vrot.slane %v407_v15, 1  ;;  %v411_v29 = vshrl.u32 %v2111_v4, 16 }
  0x2e   : > { %663 = vrot.lane.b32.xlu0 %v603_v51, %s1946_s11  ;;  %v402_v30 = vsel %vm342_vm1, %v397_v16, %v401_v17  ;;  %v2133_v31 = vor.u32 %v613_v20, %v612_v19  ;;  %v525_v33 = vsel %vm2948_vm0, %v522_v58, %v524_v21  ;;  %v421_v34 = vor.u32 %v419_v23, %v417_v22  ;;  %v1873_v19 = vld [vmem:[%s2037_s8 + $0x80] ss:$0 sps:$4 sm:$0x33]  }
  0x2f   : > { %483 = vrot.lane.b32.xlu1 %v386_v55, %s1945_s10  ;;  %v425_v36 = vrot.slane %v423_v25, 1  ;;  %v413_v37 = vor.u32 %v411_v29, %v409_v28  ;;  %v405_v38 = vor.u32 %v403_v9, %v401_v17  ;;  %v427_v39 = vshrl.u32 %v2122_v14, 16  ;;  %v2164_v55 = vld [vmem:[%s2037_s8 + $0x80] ss:$0 sps:$4 sm:$0x11]  }
  0x30   : > { %v615_v42 = vsel %vm579_vm2, %v610_v13, %v2133_v31  ;;  %v431_v43 = vshll.u32 %v2136_v32, 16  ;;  %v526_v44 = vrot.slane %v2111_v4, 1  ;;  %v528_v45 = vrot.slane %v2106_v60, 1 }
  0x31   : > { %v530_v47 = vrot.slane %v2122_v14, 1  ;;  %v2154_v48 = vcombine.low %v224_v35, %v225_v40  ;;  %v1694_v49 = vcombine.low %v257_v41, %v225_v40  ;;  %v426_v51 = vsel %vm342_vm1, %v421_v34, %v425_v36 }
  0x32   : > { %552 = vrot.lane.b32.xlu0 %v521_v61, %s1944_s9  ;;  %v418_v52 = vsel %vm342_vm1, %v413_v37, %v417_v22  ;;  %v410_v53 = vsel %vm342_vm1, %v405_v38, %v409_v28  ;;  %v429_v54 = vor.u32 %v427_v39, %v425_v36  ;;  %v2168_v56 = vrot.slane %v431_v43, 1 }
  0x33   : > { %665 = vrot.lane.b32.xlu1 %v607_v7, %s1946_s11  ;;  %v616_v58 = vrot.slane %v411_v29, 1  ;;  %v344_v59 = vshrl.u32 %v2154_v48, 16  ;;  %v346_v61 = vshll.u32 %v2154_v48, 16  ;;  %v617_v62 = vrot.slane %v407_v15, 2 }
  0x34   : > { %v620_v63 = vrot.slane %v419_v23, 1  ;;  %v511_v3 = vrot.slane %v1694_v49, 1  ;;  %v581_v7 = vshrl.u32 %v1694_v49, 16  ;;  %v621_v8 = vrot.slane %v415_v10, 2 }
  0x35   : > { %v348_v9 = vrot.slane %v346_v61, 1  ;;  %v529_v13 = vsel %vm2948_vm0, %v526_v44, %v528_v45  ;;  %v531_v16 = vsel %vm2948_vm0, %v528_v45, %v530_v47  ;;  %v624_v10 = vrot.slane %v427_v39, 1 }
  0x36   : > { %485 = vrot.lane.b32.xlu0 %v394_v12, %s1945_s10  ;;  %v463_v12 = vshll.u32 %v2157_v50, 16  ;;  %v2182_v15 = vsel %vm2948_vm0, %v511_v3, %v512_v5  ;;  %v583_v17 = vrot.slane %v581_v7, 1  ;;  %v467_v23 = vshrl.u32 %v2157_v50, 16 }
  0x37   : > { %554 = vrot.lane.b32.xlu1 %v523_v11, %s1944_s9  ;;  %v584_v11 = vshll.u32 %v1694_v49, 16  ;;  %v349_v20 = vor.u32 %v348_v9, %v344_v59  ;;  %v618_v28 = vor.u32 %v617_v62, %v616_v58  ;;  %v625_v5 = vrot.slane %v423_v25, 2 }
  0x38   : > { %v2188_v29 = vrot.slane %v463_v12, 1  ;;  %v435_v36 = vshrl.u32 %v2136_v32, 16  ;;  %v649_v39 = vshrl.u32 %v1873_v19, 16  ;;  %v644_v41 = vrot.slane %v467_v23, 1 }
  0x39   : > { %v586_v22 = vrot.slane %v584_v11, 2  ;;  %v2194_v34 = vsel %vm342_vm1, %v349_v20, %v2072_v26  ;;  %v645_v25 = vrot.slane %v463_v12, 2  ;;  %v626_v58 = vor.u32 %v625_v5, %v624_v10 }
  0x3a   : > { %667 = vrot.lane.b32.xlu0 %v611_v24, %s1946_s11  ;;  %v434_v24 = vsel %vm342_vm1, %v429_v54, %v2168_v56  ;;  %v469_v37 = vor.u32 %v467_v23, %v2188_v29  ;;  %v651_v45 = vrot.slane %v649_v39, 1  ;;  %v2216_v54 = vld [vmem:[%s2037_s8 + $0x60] sm:$0xff]   ;;  %v628_v59 = vrot.slane %v435_v36, 1 }
  0x3b   : > { %487 = vrot.lane.b32.xlu1 %v402_v30, %s1945_s10  ;;  %v471_v30 = vshll.u32 %v2164_v55, 16  ;;  %v587_v35 = vor.u32 %v586_v22, %v583_v17  ;;  %v2218_v61 = vor.u32 %v645_v25, %v644_v41  ;;  %v619_v9 = vsel %vm579_vm2, %v2133_v31, %v618_v28 }
  0x3c   : > { %v534_v11 = vrot.slane %v2216_v54, 1 }
  0x3d   : > { %v473_v38 = vrot.slane %v471_v30, 1  ;;  %v2201_v40 = vsel %vm579_vm2, %v587_v35, %v2074_v27  ;;  %v532_v27 = vrot.slane %v2136_v32, 1  ;;  %v2249_v30 = vld [vmem:[%s2037_s8 + $0x70] sm:$0xff]  }
  0x3e   : > { %556 = vrot.lane.b32.xlu0 %v525_v33, %s1944_s9  ;;  %v622_v33 = vor.u32 %v621_v8, %v620_v63  ;;  %v443_v63 = vshrl.u32 %v2216_v54, 16  ;;  %v2233_v8 = vld [vmem:[%s2037_s8 + $0x68] sm:$0xff]  }
  0x3f   : > { %669 = vrot.lane.b32.xlu1 %v615_v42, %s1946_s11  ;;  %v652_v42 = vshll.u32 %v1873_v19, 16  ;;  %v2204_v26 = vsel %vm342_vm1, %v469_v37, %v473_v38  ;;  %v447_v19 = vshll.u32 %v2233_v8, 16  ;;  %v451_v10 = vshrl.u32 %v2233_v8, 16 }
  0x40   : > { %v627_v3 = vsel %vm579_vm2, %v622_v33, %v626_v58  ;;  %v535_v31 = vsel %vm2948_vm0, %v532_v27, %v534_v11  ;;  %v536_v5 = vrot.slane %v2233_v8, 1  ;;  %v455_v37 = vshll.u32 %v2249_v30, 16 }
  0x41   : > { %v654_v49 = vrot.slane %v652_v42, 2  ;;  %v449_v23 = vrot.slane %v447_v19, 1  ;;  %v459_v42 = vshrl.u32 %v2249_v30, 16 }
  0x42   : > { %491 = vrot.lane.b32.xlu0 %v418_v52, %s1945_s10  ;;  %v623_v52 = vsel %vm579_vm2, %v618_v28, %v622_v33  ;;  %v637_v28 = vrot.slane %v447_v19, 2  ;;  %v537_v38 = vsel %vm2948_vm0, %v534_v11, %v536_v5  ;;  %v457_v25 = vrot.slane %v455_v37, 1 }
  0x43   : > { %493 = vrot.lane.b32.xlu1 %v426_v51, %s1945_s10  ;;  %v527_v51 = vsel %vm2948_vm0, %v524_v21, %v526_v44  ;;  %v655_v62 = vor.u32 %v654_v49, %v651_v45  ;;  %v533_v44 = vsel %vm2948_vm0, %v530_v47, %v532_v27  ;;  %v437_v47 = vor.u32 %v435_v36, %v2168_v56 }
  0x44   : > { %v453_v41 = vor.u32 %v451_v10, %v449_v23  ;;  %v538_v49 = vrot.slane %v2249_v30, 1 }
  0x45   : > { %v2223_v21 = vsel %vm579_vm2, %v2218_v61, %v655_v62  ;;  %v461_v62 = vor.u32 %v459_v42, %v457_v25 }
  0x46   : > { %560 = vrot.lane.b32.xlu0 %v529_v13, %s1944_s9  ;;  %v632_v13 = vrot.slane %v443_v63, 1  ;;  %v458_v45 = vsel %vm342_vm1, %v453_v41, %v457_v25  ;;  %v539_v27 = vsel %vm2948_vm0, %v536_v5, %v538_v49 }
  0x47   : > { %489 = vrot.lane.b32.xlu1 %v410_v53, %s1945_s10  ;;  %v629_v53 = vrot.slane %v431_v43, 2  ;;  %v439_v43 = vshll.u32 %v2216_v54, 16 }
  0x49   : > { %v630_v7 = vor.u32 %v629_v53, %v628_v59  ;;  %v441_v12 = vrot.slane %v439_v43, 1 }
  0x4a   : > { %495 = vrot.lane.b32.xlu0 %v434_v24, %s1945_s10  ;;  %v636_v24 = vrot.slane %v451_v10, 1 }
  0x4b   : > { %562 = vrot.lane.b32.xlu1 %v531_v16, %s1944_s9  ;;  %v633_v16 = vrot.slane %v439_v43, 2  ;;  %v631_v17 = vsel %vm579_vm2, %v626_v58, %v630_v7  ;;  %v442_v20 = vsel %vm342_vm1, %v437_v47, %v441_v12  ;;  %v445_v56 = vor.u32 %v443_v63, %v441_v12 }
  0x4c   : > { %v638_v36 = vor.u32 %v637_v28, %v636_v24  ;;  %v540_v58 = vrot.slane %v2157_v50, 1  ;;  %v466_v43 = vsel %vm342_vm1, %v461_v62, %v2188_v29  ;;  %v1875_v29 = vld [vmem:[%s2943_s1 + $0x8] sm:$0xff]  }
  0x4d   : > { %v634_v22 = vor.u32 %v633_v16, %v632_v13  ;;  %v450_v35 = vsel %vm342_vm1, %v445_v56, %v449_v23 }
  0x4e   : > { %673 = vrot.lane.b32.xlu0 %v623_v52, %s1946_s11  ;;  %v641_v52 = vrot.slane %v455_v37, 2 }
  0x4f   : > { %558 = vrot.lane.b32.xlu1 %v527_v51, %s1944_s9  ;;  %v635_v33 = vsel %vm579_vm2, %v630_v7, %v634_v22  ;;  %v639_v39 = vsel %vm579_vm2, %v634_v22, %v638_v36  ;;  %v640_v51 = vrot.slane %v459_v42, 1 }
  0x51   : > { %v642_v53 = vor.u32 %v641_v52, %v640_v51 }
  0x52   : > { %564 = vrot.lane.b32.xlu0 %v533_v44, %s1944_s9  ;;  %v542_v44 = vrot.slane %v2164_v55, 1  ;;  %v1947_v55 = vmov 0.0  }
  0x53   : > { %675 = vrot.lane.b32.xlu1 %v627_v3, %s1946_s11  ;;  %v643_v59 = vsel %vm579_vm2, %v638_v36, %v642_v53  ;;  %v647_v63 = vsel %vm579_vm2, %v642_v53, %v2218_v61  ;;  %1736 = vmatprep.subr.bf16.mxu0 %v1947_v55  ;;  %v1876_v61 = vld [vmem:[%s2943_s1 + $0x10] sm:$0xff]  }
  0x54   : > { %1796 = vmatprep.subr.bf16.mxu1 %v1947_v55  ;;  %1744 = vmatprep.mubr.msk.bf16.mxu0 %vm1948_vm3, %v1947_v55 }
  0x55   : > { %1772 = vmatprep.mubr.msk.bf16.mxu1 %vm1948_vm3, %v1947_v55 }
  0x56   : > { %671 = vrot.lane.b32.xlu0 %v619_v9, %s1946_s11 }
  0x57   : > { %677 = vrot.lane.b32.xlu1 %v631_v17, %s1946_s11 }
  0x5a   : > { %497 = vrot.lane.b32.xlu0 %v442_v20, %s1945_s10 }
  0x5b   : > { %566 = vrot.lane.b32.xlu1 %v535_v31, %s1944_s9 }
  0x5e   : > { %679 = vrot.lane.b32.xlu0 %v635_v33, %s1946_s11 }
  0x5f   : > { %499 = vrot.lane.b32.xlu1 %v450_v35, %s1945_s10 }
  0x62   : > { %568 = vrot.lane.b32.xlu0 %v537_v38, %s1944_s9 }
  0x63   : > { %681 = vrot.lane.b32.xlu1 %v639_v39, %s1946_s11 }
  0x66   : > { %475 = vrot.lane.b32.xlu0 %v2194_v34, %s1945_s10  ;;  %v541_v34 = vsel %vm2948_vm0, %v538_v49, %v540_v58 }
  0x67   : > { %501 = vrot.lane.b32.xlu1 %v458_v45, %s1945_s10 }
  0x6a   : > { %544 = vrot.lane.b32.xlu0 %v2182_v15, %s1944_s9  ;;  %v543_v15 = vsel %vm2948_vm0, %v540_v58, %v542_v44 }
  0x6b   : > { %570 = vrot.lane.b32.xlu1 %v539_v27, %s1944_s9 }
  0x6e   : > { %657 = vrot.lane.b32.xlu0 %v2201_v40, %s1946_s11  ;;  %v1874_v40 = vld [vmem:[%s2943_s1] sm:$0xff]  }
  0x6f   : > { %683 = vrot.lane.b32.xlu1 %v643_v59, %s1946_s11  ;;  %1737 = vmatpush3.bf16.msra.mxu0 %v1874_v40 }
  0x70   : > { %1738 = vmatprep.subr.bf16.mxu0 %v1947_v55  ;;  %1800 = vmatpush3.bf16.msra.mxu1 %v1874_v40 }
  0x71   : > { %1797 = vmatprep.subr.bf16.mxu1 %v1947_v55 }
  0x72   : > { %572 = vrot.lane.b32.xlu0 %v541_v34, %s1944_s9 }
  0x73   : > { %503 = vrot.lane.b32.xlu1 %v466_v43, %s1945_s10  ;;  %1739 = vmatpush3.bf16.msra.mxu0 %v1875_v29 }
  0x74   : > { %1740 = vmatprep.subr.bf16.mxu0 %v1947_v55  ;;  %1801 = vmatpush3.bf16.msra.mxu1 %v1875_v29 }
  0x75   : > { %1798 = vmatprep.subr.bf16.mxu1 %v1947_v55 }
  0x76   : > { %574 = vrot.lane.b32.xlu0 %v543_v15, %s1944_s9 }
  0x77   : > { %685 = vrot.lane.b32.xlu1 %v647_v63, %s1946_s11  ;;  %1741 = vmatpush3.bf16.msra.mxu0 %v1876_v61 }
  0x78   : > { %1802 = vmatpush3.bf16.msra.mxu1 %v1876_v61  ;;  %1742 = vmatprep.subr.bf16.mxu0 %v1947_v55 }
  0x79   : > { %1799 = vmatprep.subr.bf16.mxu1 %v1947_v55 }
  0x7b   : > { %505 = vrot.lane.b32.xlu1 %v2204_v26, %s1945_s10  ;;  %v1877_v26 = vld [vmem:[%s2943_s1 + $0x18] sm:$0xff]  }
  0x7c   : > { %1743 = vmatpush3.bf16.msra.mxu0 %v1877_v26  ;;  %1803 = vmatpush3.bf16.msra.mxu1 %v1877_v26 }
  0x7f   : > { %687 = vrot.lane.b32.xlu1 %v2223_v21, %s1946_s11  ;;  %s215_s11 = sand.u32 1, %s1934_s19  }
  0x80   : > { %s1804_s12 = smul.u32 40, %s215_s11  ;;  %s2900_s22 = scalar_lea.sflag [#allocation4], %s215_s11 }
  0x82   : > { %s217_s14 = scalar_lea.vmem [#allocation3], %s1804_s12 }
  0x83   : > { %s1610_s15 = sshll.u32 %s217_s14, 4  ;;  %s2896_s15 = int_to_ptr.vmem [resolvable:$true] %s1610_s15 }
  0x84   : > { %s1880_s24 = scalar_lea.vmem %s2896_s15, 640 }
  0x85   : > { %p1881_p11 = scmp.ne.s32.totalorder %s2896_s15, %s1880_s24 }
  0x87   : > { %p1882_p12 = pnand %p1881_p11, %p2022_p5 }
  0x89   : > { %p1883_p13 = pneg %p1882_p12 }
  0x90   : > { %v549_v3 = vpop.permute.xlu0 %548  ;;  %v547_v7 = vpop.permute.xlu1 %546 }
  0x94   : > { %v551_v9 = vpop.permute.xlu0 %550 }
  0x95   : > { %v482_v21 = vpop.permute.xlu1 %481 }
  0x96   : > { %v697_v19 = vsel %vm689_vm4, %v2043_v1, %v482_v21 }
  0x97   : > { %v730_v22 = vsel %vm722_vm6, %v697_v19, %v551_v9 }
  0x98   : > { %v478_v11 = vpop.permute.xlu0 %477 }
  0x99   : > { %v660_v47 = vpop.permute.xlu1 %659  ;;  %v693_v12 = vsel %vm689_vm4, %v2046_v2, %v478_v11 }
  0x9a   : > { %v726_v13 = vsel %vm722_vm6, %v693_v12, %v547_v7 }
  0x9b   : > { %v2321_v16 = vsel %vm755_vm5, %v726_v13, %v660_v47 }
  0x9c   : > { %v480_v17 = vpop.permute.xlu0 %479  ;;  %801 = vrot.lane.b32.xlu0 %v2321_v16, %s1949_s25 }
  0x9d   : > { %v662_v10 = vpop.permute.xlu1 %661  ;;  %v695_v31 = vsel %vm689_vm4, %v2040_v0, %v480_v17 }
  0x9e   : > { %v728_v2 = vsel %vm722_vm6, %v695_v31, %v549_v3 }
  0x9f   : > { %v2331_v20 = vsel %vm755_vm5, %v728_v2, %v662_v10 }
  0xa0   : > { %828 = vrot.lane.b32.xlu1 %v2331_v20, %s1950_s29  ;;  %v664_v56 = vpop.permute.xlu0 %663 }
  0xa1   : > { %v484_v23 = vpop.permute.xlu1 %483  ;;  %v2337_v24 = vsel %vm755_vm5, %v730_v22, %v664_v56 }
  0xa2   : > { %855 = vrot.lane.b32.xlu0 %v2337_v24, %s1951_s30  ;;  %v699_v0 = vsel %vm689_vm4, %v2052_v6, %v484_v23 }
  0xa4   : > { %830 = vrot.lane.b32.xlu1 %v2337_v24, %s1950_s29  ;;  %v553_v1 = vpop.permute.xlu0 %552 }
  0xa5   : > { %v666_v28 = vpop.permute.xlu1 %665  ;;  %v732_v33 = vsel %vm722_vm6, %v699_v0, %v553_v1 }
  0xa6   : > { %803 = vrot.lane.b32.xlu0 %v2331_v20, %s1949_s25  ;;  %v2349_v5 = vsel %vm755_vm5, %v732_v33, %v666_v28 }
  0xa8   : > { %832 = vrot.lane.b32.xlu1 %v2349_v5, %s1950_s29  ;;  %v486_v35 = vpop.permute.xlu0 %485 }
  0xa9   : > { %v555_v36 = vpop.permute.xlu1 %554  ;;  %v701_v37 = vsel %vm689_vm4, %v2068_v18, %v486_v35 }
  0xaa   : > { %857 = vrot.lane.b32.xlu0 %v2349_v5, %s1951_s30  ;;  %v734_v41 = vsel %vm722_vm6, %v701_v37, %v555_v36 }
  0xac   : > { %807 = vrot.lane.b32.xlu1 %v2349_v5, %s1949_s25  ;;  %v668_v6 = vpop.permute.xlu0 %667 }
  0xad   : > { %v488_v38 = vpop.permute.xlu1 %487  ;;  %v2365_v42 = vsel %vm755_vm5, %v734_v41, %v668_v6 }
  0xae   : > { %805 = vrot.lane.b32.xlu0 %v2337_v24, %s1949_s25  ;;  %v703_v39 = vsel %vm689_vm4, %v2090_v46, %v488_v38 }
  0xb0   : > { %v557_v25 = vpop.permute.xlu0 %556 }
  0xb1   : > { %v670_v45 = vpop.permute.xlu1 %669  ;;  %v736_v49 = vsel %vm722_vm6, %v703_v39, %v557_v25 }
  0xb2   : > { %859 = vrot.lane.b32.xlu0 %v2365_v42, %s1951_s30  ;;  %v2371_v18 = vsel %vm755_vm5, %v736_v49, %v670_v45 }
  0xb3   : > { %861 = vrot.lane.b32.xlu1 %v2371_v18, %s1951_s30 }
  0xb4   : > { %v492_v51 = vpop.permute.xlu0 %491 }
  0xb5   : > { %v494_v46 = vpop.permute.xlu1 %493  ;;  %v707_v59 = vsel %vm689_vm4, %v2111_v4, %v492_v51 }
  0xb6   : > { %834 = vrot.lane.b32.xlu0 %v2365_v42, %s1950_s29  ;;  %v709_v15 = vsel %vm689_vm4, %v2106_v60, %v494_v46 }
  0xb8   : > { %v561_v52 = vpop.permute.xlu0 %560 }
  0xb9   : > { %v490_v27 = vpop.permute.xlu1 %489  ;;  %v740_v62 = vsel %vm722_vm6, %v707_v59, %v561_v52 }
  0xba   : > { %809 = vrot.lane.b32.xlu0 %v2365_v42, %s1949_s25  ;;  %v705_v4 = vsel %vm689_vm4, %v2101_v57, %v490_v27 }
  0xbc   : > { %v496_v53 = vpop.permute.xlu0 %495 }
  0xbd   : > { %v563_v58 = vpop.permute.xlu1 %562  ;;  %v711_v3 = vsel %vm689_vm4, %v2122_v14, %v496_v53 }
  0xbe   : > { %836 = vrot.lane.b32.xlu0 %v2371_v18, %s1950_s29  ;;  %v742_v40 = vsel %vm722_vm6, %v709_v15, %v563_v58 }
  0xc0   : > { %v674_v34 = vpop.permute.xlu0 %673 }
  0xc1   : > { %v559_v44 = vpop.permute.xlu1 %558  ;;  %v2385_v43 = vsel %vm755_vm5, %v740_v62, %v674_v34 }
  0xc2   : > { %815 = vrot.lane.b32.xlu1 %v2385_v43, %s1949_s25  ;;  %v738_v7 = vsel %vm722_vm6, %v705_v4, %v559_v44 }
  0xc4   : > { %v565_v63 = vpop.permute.xlu0 %564 }
  0xc5   : > { %v676_v29 = vpop.permute.xlu1 %675  ;;  %v744_v60 = vsel %vm722_vm6, %v711_v3, %v565_v63 }
  0xc6   : > { %v2393_v61 = vsel %vm755_vm5, %v742_v40, %v676_v29 }
  0xc7   : > { %842 = vrot.lane.b32.xlu1 %v2393_v61, %s1950_s29 }
  0xc8   : > { %v672_v26 = vpop.permute.xlu0 %671 }
  0xc9   : > { %v678_v9 = vpop.permute.xlu1 %677  ;;  %v2404_v21 = vsel %vm755_vm5, %v738_v7, %v672_v26 }
  0xca   : > { %v2407_v11 = vsel %vm755_vm5, %v744_v60, %v678_v9  ;;  %863 = vrot.lane.b32.xlu0 %v2404_v21, %s1951_s30 }
  0xcb   : > { %869 = vrot.lane.b32.xlu1 %v2407_v11, %s1951_s30 }
  0xcc   : > { %v498_v57 = vpop.permute.xlu0 %497 }
  0xcd   : > { %v567_v14 = vpop.permute.xlu1 %566  ;;  %v713_v47 = vsel %vm689_vm4, %v2136_v32, %v498_v57 }
  0xce   : > { %811 = vrot.lane.b32.xlu0 %v2371_v18, %s1949_s25  ;;  %v746_v17 = vsel %vm722_vm6, %v713_v47, %v567_v14 }
  0xcf   : > { %817 = vrot.lane.b32.xlu1 %v2393_v61, %s1949_s25 }
  0xd0   : > { %v680_v12 = vpop.permute.xlu0 %679 }
  0xd1   : > { %v500_v13 = vpop.permute.xlu1 %499  ;;  %v2425_v31 = vsel %vm755_vm5, %v746_v17, %v680_v12 }
  0xd2   : > { %838 = vrot.lane.b32.xlu0 %v2404_v21, %s1950_s29  ;;  %v715_v22 = vsel %vm689_vm4, %v2216_v54, %v500_v13 }
  0xd3   : > { %844 = vrot.lane.b32.xlu1 %v2407_v11, %s1950_s29 }
  0xd4   : > { %v569_v19 = vpop.permute.xlu0 %568 }
  0xd5   : > { %v682_v10 = vpop.permute.xlu1 %681  ;;  %v748_v0 = vsel %vm722_vm6, %v715_v22, %v569_v19 }
  0xd6   : > { %865 = vrot.lane.b32.xlu0 %v2385_v43, %s1951_s30  ;;  %v2443_v28 = vsel %vm755_vm5, %v748_v0, %v682_v10 }
  0xd7   : > { %871 = vrot.lane.b32.xlu1 %v2425_v31, %s1951_s30 }
  0xd8   : > { %v476_v32 = vpop.permute.xlu0 %475 }
  0xd9   : > { %v502_v2 = vpop.permute.xlu1 %501  ;;  %v691_v52 = vsel %vm689_vm4, %v2154_v48, %v476_v32 }
  0xda   : > { %813 = vrot.lane.b32.xlu0 %v2404_v21, %s1949_s25  ;;  %v717_v54 = vsel %vm689_vm4, %v2233_v8, %v502_v2 }
  0xdb   : > { %819 = vrot.lane.b32.xlu1 %v2407_v11, %s1949_s25 }
  0xdc   : > { %v545_v56 = vpop.permute.xlu0 %544 }
  0xdd   : > { %v571_v23 = vpop.permute.xlu1 %570  ;;  %v724_v27 = vsel %vm722_vm6, %v691_v52, %v545_v56 }
  0xde   : > { %840 = vrot.lane.b32.xlu0 %v2385_v43, %s1950_s29  ;;  %v750_v36 = vsel %vm722_vm6, %v717_v54, %v571_v23 }
  0xdf   : > { %846 = vrot.lane.b32.xlu1 %v2425_v31, %s1950_s29 }
  0xe0   : > { %v658_v33 = vpop.permute.xlu0 %657 }
  0xe1   : > { %v684_v1 = vpop.permute.xlu1 %683  ;;  %v757_v53 = vsel %vm755_vm5, %v724_v27, %v658_v33 }
  0xe2   : > { %867 = vrot.lane.b32.xlu0 %v2393_v61, %s1951_s30  ;;  %v783_v38 = vsel %vm755_vm5, %v750_v36, %v684_v1 }
  0xe3   : > { %873 = vrot.lane.b32.xlu1 %v2443_v28, %s1951_s30 }
  0xe4   : > { %v573_v37 = vpop.permute.xlu0 %572 }
  0xe5   : > { %v504_v35 = vpop.permute.xlu1 %503 }
  0xe6   : > { %821 = vrot.lane.b32.xlu0 %v2425_v31, %s1949_s25  ;;  %v719_v6 = vsel %vm689_vm4, %v2249_v30, %v504_v35 }
  0xe7   : > { %848 = vrot.lane.b32.xlu1 %v2443_v28, %s1950_s29  ;;  %v752_v8 = vsel %vm722_vm6, %v719_v6, %v573_v37 }
  0xe8   : > { %v575_v45 = vpop.permute.xlu0 %574 }
  0xe9   : > { %v686_v39 = vpop.permute.xlu1 %685 }
  0xea   : > { %875 = vrot.lane.b32.xlu0 %v783_v38, %s1951_s30  ;;  %v785_v41 = vsel %vm755_vm5, %v752_v8, %v686_v39 }
  0xeb   : > { %823 = vrot.lane.b32.xlu1 %v2443_v28, %s1949_s25 }
  0xed   : > { %v506_v25 = vpop.permute.xlu1 %505 }
  0xee   : > { %850 = vrot.lane.b32.xlu0 %v783_v38, %s1950_s29  ;;  %v721_v30 = vsel %vm689_vm4, %v2157_v50, %v506_v25 }
  0xef   : > { %877 = vrot.lane.b32.xlu1 %v785_v41, %s1951_s30  ;;  %v754_v49 = vsel %vm722_vm6, %v721_v30, %v575_v45 }
  0xf1   : > { %v688_v51 = vpop.permute.xlu1 %687 }
  0xf2   : > { %825 = vrot.lane.b32.xlu0 %v783_v38, %s1949_s25  ;;  %v787_v46 = vsel %vm755_vm5, %v754_v49, %v688_v51  ;;  %s1952_s25 = smov [#allocation3]  }
  0xf3   : > { %852 = vrot.lane.b32.xlu1 %v785_v41, %s1950_s29  ;;  %s1884_s29 = sshll.u32 %s1952_s25, 4  ;;  %s1885_s29 = int_to_ptr.vmem [resolvable:$false] %s1884_s29 }
  0xf4   : > { %p1887_p0 = scmp.lt.s32.totalorder %s2896_s15, %s1885_s29 }
  0xf6   : > { %879 = vrot.lane.b32.xlu0 %v787_v46, %s1951_s30  ;;  %s1886_s30 = scalar_lea.vmem %s1885_s29, 1280 }
  0xf7   : > { %p1888_p1 = scmp.lt.s32.totalorder %s1886_s30, %s1880_s24 }
  0xf9   : > { %p1889_p2 = por %p1888_p1, %p1887_p0 }
  0xfb   : > { %p1890_p3 = pnand %p1889_p2, %p1883_p13 }
 0x10e   : > { %v802_v50 = vpop.permute.xlu0 %801 }
 0x10f   : > { %v883_v58 = vsel %vm881_vm7, %v757_v53, %v802_v50 }
 0x112   : > { %v829_v59 = vpop.permute.xlu1 %828 }
 0x113   : > { %v910_v62 = vsel %vm908_vm8, %v883_v58, %v829_v59 }
 0x114   : > { %v856_v34 = vpop.permute.xlu0 %855 }
 0x115   : > { %v937_v44 = vsel %vm935_vm9, %v910_v62, %v856_v34 }
 0x116   : > { %1745 = vmatmul.mubr.msk.bf16.vlgmr.msra.gmra.mrb[0].mxu0 %vm994_vm10, %v937_v44  ;;  %v831_v63 = vpop.permute.xlu1 %830 }
 0x117   : > { %1748 = vmatprep.mubr.msk.bf16.mxu0 %vm1948_vm3, %v1947_v55 }
 0x118   : > { %v804_v48 = vpop.permute.xlu0 %803 }
 0x119   : > { %v885_v15 = vsel %vm881_vm7, %v2321_v16, %v804_v48 }
 0x11a   : > { %v912_v40 = vsel %vm908_vm8, %v885_v15, %v831_v63  ;;  %v833_v3 = vpop.permute.xlu1 %832 }
 0x11c   : > { %v858_v29 = vpop.permute.xlu0 %857 }
 0x11d   : > { %v939_v4 = vsel %vm935_vm9, %v912_v40, %v858_v29 }
 0x11e   : > { %1749 = vmatmul.mubr.msk.bf16.gmra.mrb[4].mxu0 %vm994_vm10, %v939_v4  ;;  %v808_v57 = vpop.permute.xlu1 %807 }
 0x11f   : > { %1752 = vmatprep.mubr.msk.bf16.mxu0 %vm1948_vm3, %v1947_v55  ;;  %v889_v47 = vsel %vm881_vm7, %v2337_v24, %v808_v57 }
 0x120   : > { %v806_v7 = vpop.permute.xlu0 %805 }
 0x121   : > { %v887_v26 = vsel %vm881_vm7, %v2331_v20, %v806_v7 }
 0x122   : > { %v914_v60 = vsel %vm908_vm8, %v887_v26, %v833_v3 }
 0x124   : > { %v860_v9 = vpop.permute.xlu0 %859 }
 0x125   : > { %v941_v16 = vsel %vm935_vm9, %v914_v60, %v860_v9  ;;  %v862_v13 = vpop.permute.xlu1 %861  ;;  %v1158_v9 = vlaneseq }
 0x126   : > { %1753 = vmatmul.mubr.msk.bf16.gmra.mrb[8].mxu0 %vm994_vm10, %v941_v16 }
 0x127   : > { %1756 = vmatprep.mubr.msk.bf16.mxu0 %vm1948_vm3, %v1947_v55  ;;  %v1159_v16 = vshrl.u32 %v1158_v9, 7 }
 0x128   : > { %v835_v14 = vpop.permute.xlu0 %834 }
 0x129   : > { %v916_v12 = vsel %vm908_vm8, %v889_v47, %v835_v14  ;;  %v1160_v57 = vadd.s32 8, %v1159_v16 }
 0x12a   : > { %v943_v20 = vsel %vm935_vm9, %v916_v12, %v862_v13 }
 0x12b   : > { %vm1162_vm11 = vcmp.lt.s32.totalorder %v1160_v57, 13 }
 0x12c   : > { %v810_v17 = vpop.permute.xlu0 %809  ;;  %v2566_v47 = vsel %vm1162_vm11, 1.0, %v1947_v55 }
 0x12d   : > { %v891_v2 = vsel %vm881_vm7, %v2349_v5, %v810_v17 }
 0x12e   : > { %1757 = vmatmul.mubr.msk.bf16.gmra.mrb[12].mxu0 %vm994_vm10, %v943_v20 }
 0x12f   : > { %1760 = vmatprep.mubr.msk.bf16.mxu0 %vm1948_vm3, %v1947_v55 }
 0x130   : > { %v837_v10 = vpop.permute.xlu0 %836 }
 0x131   : > { %v918_v22 = vsel %vm908_vm8, %v891_v2, %v837_v10 }
 0x134   : > { %v816_v19 = vpop.permute.xlu1 %815 }
 0x135   : > { %v897_v24 = vsel %vm881_vm7, %v2404_v21, %v816_v19 }
 0x139   : > { %v843_v32 = vpop.permute.xlu1 %842 }
 0x13a   : > { %v924_v23 = vsel %vm908_vm8, %v897_v24, %v843_v32 }
 0x13c   : > { %v864_v56 = vpop.permute.xlu0 %863 }
 0x13d   : > { %v870_v0 = vpop.permute.xlu1 %869  ;;  %v945_v1 = vsel %vm935_vm9, %v918_v22, %v864_v56 }
 0x13e   : > { %v951_v33 = vsel %vm935_vm9, %v924_v23, %v870_v0  ;;  %1761 = vmatmul.mubr.msk.bf16.gmra.mrb[16].mxu0 %vm994_vm10, %v945_v1 }
 0x13f   : > { %1773 = vmatmul.mubr.msk.bf16.vlgmr.msra.gmra.mrb[0].mxu1 %vm994_vm10, %v951_v33  ;;  %1764 = vmatprep.mubr.msk.bf16.mxu0 %vm1948_vm3, %v1947_v55 }
 0x140   : > { %v812_v5 = vpop.permute.xlu0 %811  ;;  %1776 = vmatprep.mubr.msk.bf16.mxu1 %vm1948_vm3, %v1947_v55 }
 0x141   : > { %v818_v21 = vpop.permute.xlu1 %817  ;;  %v893_v36 = vsel %vm881_vm7, %v2365_v42, %v812_v5 }
 0x142   : > { %v899_v6 = vsel %vm881_vm7, %v2385_v43, %v818_v21 }
 0x144   : > { %v839_v54 = vpop.permute.xlu0 %838 }
 0x145   : > { %v845_v35 = vpop.permute.xlu1 %844  ;;  %v920_v37 = vsel %vm908_vm8, %v893_v36, %v839_v54 }
 0x146   : > { %v926_v8 = vsel %vm908_vm8, %v899_v6, %v845_v35 }
 0x148   : > { %v866_v38 = vpop.permute.xlu0 %865 }
 0x149   : > { %v872_v39 = vpop.permute.xlu1 %871  ;;  %v947_v41 = vsel %vm935_vm9, %v920_v37, %v866_v38 }
 0x14a   : > { %v953_v25 = vsel %vm935_vm9, %v926_v8, %v872_v39  ;;  %1765 = vmatmul.mubr.msk.bf16.gmra.mrb[20].mxu0 %vm994_vm10, %v947_v41 }
 0x14b   : > { %1777 = vmatmul.mubr.msk.bf16.gmra.mrb[4].mxu1 %vm994_vm10, %v953_v25  ;;  %1768 = vmatprep.mubr.msk.bf16.mxu0 %vm1948_vm3, %v1947_v55 }
 0x14c   : > { %v814_v42 = vpop.permute.xlu0 %813  ;;  %1780 = vmatprep.mubr.msk.bf16.mxu1 %vm1948_vm3, %v1947_v55 }
 0x14d   : > { %v820_v43 = vpop.permute.xlu1 %819  ;;  %v895_v49 = vsel %vm881_vm7, %v2371_v18, %v814_v42 }
 0x14e   : > { %v901_v51 = vsel %vm881_vm7, %v2393_v61, %v820_v43 }
 0x150   : > { %v841_v45 = vpop.permute.xlu0 %840 }
 0x151   : > { %v847_v30 = vpop.permute.xlu1 %846  ;;  %v922_v46 = vsel %vm908_vm8, %v895_v49, %v841_v45 }
 0x152   : > { %v928_v27 = vsel %vm908_vm8, %v901_v51, %v847_v30 }
 0x154   : > { %v868_v52 = vpop.permute.xlu0 %867 }
 0x155   : > { %v874_v50 = vpop.permute.xlu1 %873  ;;  %v949_v53 = vsel %vm935_vm9, %v922_v46, %v868_v52 }
 0x156   : > { %v955_v58 = vsel %vm935_vm9, %v928_v27, %v874_v50  ;;  %1769 = vmatmul.mubr.msk.bf16.gmra.mrb[24].mxu0 %vm994_vm10, %v949_v53 }
 0x157   : > { %1781 = vmatmul.mubr.msk.bf16.gmra.mrb[8].mxu1 %vm994_vm10, %v955_v58 }
 0x158   : > { %v822_v59 = vpop.permute.xlu0 %821  ;;  %1784 = vmatprep.mubr.msk.bf16.mxu1 %vm1948_vm3, %v1947_v55 }
 0x159   : > { %v849_v18 = vpop.permute.xlu1 %848  ;;  %v903_v61 = vsel %vm881_vm7, %v2407_v11, %v822_v59 }
 0x15a   : > { %v930_v62 = vsel %vm908_vm8, %v903_v61, %v849_v18 }
 0x15c   : > { %v876_v34 = vpop.permute.xlu0 %875 }
 0x15d   : > { %v824_v44 = vpop.permute.xlu1 %823  ;;  %v957_v48 = vsel %vm935_vm9, %v930_v62, %v876_v34 }
 0x15e   : > { %v905_v63 = vsel %vm881_vm7, %v2425_v31, %v824_v44 }
 0x15f   : > { %1785 = vmatmul.mubr.msk.bf16.gmra.mrb[12].mxu1 %vm994_vm10, %v957_v48 }
 0x160   : > { %v851_v15 = vpop.permute.xlu0 %850  ;;  %1788 = vmatprep.mubr.msk.bf16.mxu1 %vm1948_vm3, %v1947_v55 }
 0x161   : > { %v878_v40 = vpop.permute.xlu1 %877  ;;  %v932_v29 = vsel %vm908_vm8, %v905_v63, %v851_v15 }
 0x162   : > { %v959_v11 = vsel %vm935_vm9, %v932_v29, %v878_v40 }
 0x164   : > { %v826_v4 = vpop.permute.xlu0 %825 }
 0x165   : > { %v853_v3 = vpop.permute.xlu1 %852  ;;  %v907_v7 = vsel %vm881_vm7, %v2443_v28, %v826_v4 }
 0x166   : > { %v934_v60 = vsel %vm908_vm8, %v907_v7, %v853_v3 }
 0x167   : > { %1789 = vmatmul.mubr.msk.bf16.gmra.mrb[16].mxu1 %vm994_vm10, %v959_v11 }
 0x168   : > { %1792 = vmatprep.mubr.msk.bf16.mxu1 %vm1948_vm3, %v1947_v55  ;;  %v880_v26 = vpop.permute.xlu0 %879 }
 0x169   : > { %v961_v31 = vsel %vm935_vm9, %v934_v60, %v880_v26 }
 0x16f   : > { %1793 = vmatmul.mubr.msk.bf16.gmra.mrb[20].mxu1 %vm994_vm10, %v961_v31 }
 0x1e9   : > { %v2563_v14 = vpop.f32.mrb[0].mxu0 }
 0x1ea   : > { %v1746_v12 = vpop.f32.mrb[1].mxu0  ;;  %v1227_v17 = vmul.f32 %v2563_v14, %v2563_v14 }
 0x1eb   : > { %v2568_v13 = vpop.f32.mrb[2].mxu0 }
 0x1ec   : > { %v1170_v28 = vmul.f32 %v2566_v47, %v2568_v13  ;;  %v1747_v20 = vpop.f32.mrb[3].mxu0 }
 0x1ee   : > { %v1228_v19 = vmul.f32 %v1170_v28, %v2568_v13  ;;  %v1195_v10 = vadd.f32 %v1170_v28, %v2563_v14 }
 0x1f0   : > { %v1253_v32 = vadd.f32 %v1228_v19, %v1227_v17 }
 0x1f1   : > { %v2576_v2 = vpop.f32.mrb[4].mxu0 }
 0x1f2   : > { %v1196_v55 = vadd.f32 %v1195_v10, %v2576_v2  ;;  %v1229_v22 = vmul.f32 %v2576_v2, %v2576_v2  ;;  %v1750_v24 = vpop.f32.mrb[5].mxu0 }
 0x1f3   : > { %v2581_v56 = vpop.f32.mrb[6].mxu0 }
 0x1f4   : > { %v1254_v23 = vadd.f32 %v1253_v32, %v1229_v22  ;;  %v1172_v0 = vmul.f32 %v2566_v47, %v2581_v56  ;;  %v1751_v1 = vpop.f32.mrb[7].mxu0 }
 0x1f6   : > { %v1230_v33 = vmul.f32 %v1172_v0, %v2581_v56  ;;  %v1197_v5 = vadd.f32 %v1196_v55, %v1172_v0 }
 0x1f8   : > { %v1255_v21 = vadd.f32 %v1254_v23, %v1230_v33 }
 0x1f9   : > { %v2586_v54 = vpop.f32.mrb[8].mxu0 }
 0x1fa   : > { %v1198_v35 = vadd.f32 %v1197_v5, %v2586_v54  ;;  %v1231_v36 = vmul.f32 %v2586_v54, %v2586_v54  ;;  %v1754_v6 = vpop.f32.mrb[9].mxu0 }
 0x1fb   : > { %v2591_v37 = vpop.f32.mrb[10].mxu0 }
 0x1fc   : > { %v1256_v38 = vadd.f32 %v1255_v21, %v1231_v36  ;;  %v1174_v8 = vmul.f32 %v2566_v47, %v2591_v37  ;;  %v1755_v39 = vpop.f32.mrb[11].mxu0 }
 0x1fe   : > { %v1232_v41 = vmul.f32 %v1174_v8, %v2591_v37  ;;  %v1199_v25 = vadd.f32 %v1198_v35, %v1174_v8 }
 0x200   : > { %v1257_v42 = vadd.f32 %v1256_v38, %v1232_v41 }
 0x201   : > { %v2596_v43 = vpop.f32.mrb[12].mxu0 }
 0x202   : > { %v1200_v45 = vadd.f32 %v1199_v25, %v2596_v43  ;;  %v1233_v30 = vmul.f32 %v2596_v43, %v2596_v43  ;;  %v1758_v49 = vpop.f32.mrb[13].mxu0 }
 0x203   : > { %v2601_v51 = vpop.f32.mrb[14].mxu0 }
 0x204   : > { %v1258_v46 = vadd.f32 %v1257_v42, %v1233_v30  ;;  %v1176_v52 = vmul.f32 %v2566_v47, %v2601_v51  ;;  %v1759_v27 = vpop.f32.mrb[15].mxu0 }
 0x206   : > { %v1234_v50 = vmul.f32 %v1176_v52, %v2601_v51  ;;  %v1201_v53 = vadd.f32 %v1200_v45, %v1176_v52 }
 0x208   : > { %v1259_v58 = vadd.f32 %v1258_v46, %v1234_v50 }
 0x211   : > { %v2606_v59 = vpop.f32.mrb[16].mxu0 }
 0x212   : > { %v1202_v18 = vadd.f32 %v1201_v53, %v2606_v59  ;;  %v1235_v61 = vmul.f32 %v2606_v59, %v2606_v59  ;;  %v2611_v62 = vpop.f32.mrb[0].mxu1  ;;  %v1762_v34 = vpop.f32.mrb[17].mxu0 }
 0x213   : > { %v1774_v44 = vpop.f32.mrb[1].mxu1  ;;  %v2613_v48 = vpop.f32.mrb[18].mxu0  ;;  %v1241_v42 = vmul.f32 %v2611_v62, %v2611_v62 }
 0x214   : > { %v1260_v15 = vadd.f32 %v1259_v58, %v1235_v61  ;;  %v1178_v63 = vmul.f32 %v2566_v47, %v2613_v48  ;;  %v2617_v40 = vpop.f32.mrb[2].mxu1  ;;  %v1763_v29 = vpop.f32.mrb[19].mxu0 }
 0x215   : > { %v1775_v4 = vpop.f32.mrb[3].mxu1  ;;  %v1184_v39 = vmul.f32 %v2566_v47, %v2617_v40 }
 0x216   : > { %v1236_v11 = vmul.f32 %v1178_v63, %v2613_v48  ;;  %v1203_v3 = vadd.f32 %v1202_v18, %v1178_v63 }
 0x217   : > { %v1242_v49 = vmul.f32 %v1184_v39, %v2617_v40 }
 0x218   : > { %v1261_v7 = vadd.f32 %v1260_v15, %v1236_v11 }
 0x21d   : > { %v2620_v26 = vpop.f32.mrb[20].mxu0 }
 0x21e   : > { %v1204_v60 = vadd.f32 %v1203_v3, %v2620_v26  ;;  %v1237_v31 = vmul.f32 %v2620_v26, %v2620_v26  ;;  %v2625_v9 = vpop.f32.mrb[4].mxu1  ;;  %v1766_v16 = vpop.f32.mrb[21].mxu0 }
 0x21f   : > { %v1778_v57 = vpop.f32.mrb[5].mxu1  ;;  %v2627_v12 = vpop.f32.mrb[22].mxu0  ;;  %v1243_v58 = vmul.f32 %v2625_v9, %v2625_v9 }
 0x220   : > { %v1262_v28 = vadd.f32 %v1261_v7, %v1237_v31  ;;  %v1180_v20 = vmul.f32 %v2566_v47, %v2627_v12  ;;  %v2631_v17 = vpop.f32.mrb[6].mxu1  ;;  %v1767_v19 = vpop.f32.mrb[23].mxu0 }
 0x221   : > { %v1779_v10 = vpop.f32.mrb[7].mxu1  ;;  %v1186_v46 = vmul.f32 %v2566_v47, %v2631_v17 }
 0x222   : > { %v1238_v32 = vmul.f32 %v1180_v20, %v2627_v12  ;;  %v1205_v55 = vadd.f32 %v1204_v60, %v1180_v20 }
 0x223   : > { %v1244_v15 = vmul.f32 %v1186_v46, %v2631_v17 }
 0x224   : > { %v1263_v22 = vadd.f32 %v1262_v28, %v1238_v32 }
 0x229   : > { %v2634_v24 = vpop.f32.mrb[24].mxu0 }
 0x22a   : > { %v1206_v23 = vadd.f32 %v1205_v55, %v2634_v24  ;;  %v1239_v0 = vmul.f32 %v2634_v24, %v2634_v24  ;;  %v2639_v1 = vpop.f32.mrb[8].mxu1  ;;  %v1770_v33 = vpop.f32.mrb[25].mxu0 }
 0x22b   : > { %v1782_v5 = vpop.f32.mrb[9].mxu1  ;;  %v2641_v21 = vpop.f32.mrb[26].mxu0  ;;  %v1245_v11 = vmul.f32 %v2639_v1, %v2639_v1 }
 0x22c   : > { %v1264_v35 = vadd.f32 %v1263_v22, %v1239_v0  ;;  %v1182_v36 = vmul.f32 %v2566_v47, %v2641_v21  ;;  %v2645_v6 = vpop.f32.mrb[10].mxu1  ;;  %v1771_v38 = vpop.f32.mrb[27].mxu0 }
 0x22d   : > { %v1783_v8 = vpop.f32.mrb[11].mxu1  ;;  %v1188_v63 = vmul.f32 %v2566_v47, %v2645_v6 }
 0x22e   : > { %v1207_v41 = vadd.f32 %v1206_v23, %v1182_v36  ;;  %v1240_v25 = vmul.f32 %v1182_v36, %v2641_v21 }
 0x22f   : > { %v1246_v60 = vmul.f32 %v1188_v63, %v2645_v6 }
 0x230   : > { %v1208_v45 = vadd.f32 %v1207_v41, %v2611_v62  ;;  %v1265_v30 = vadd.f32 %v1264_v35, %v1240_v25 }
 0x232   : > { %v1209_v52 = vadd.f32 %v1208_v45, %v1184_v39  ;;  %v1266_v27 = vadd.f32 %v1265_v30, %v1241_v42  ;;  %v2656_v50 = vpop.f32.mrb[12].mxu1 }
 0x233   : > { %v1786_v53 = vpop.f32.mrb[13].mxu1  ;;  %v1247_v32 = vmul.f32 %v2656_v50, %v2656_v50 }
 0x234   : > { %v1267_v18 = vadd.f32 %v1266_v27, %v1242_v49  ;;  %v1210_v61 = vadd.f32 %v1209_v52, %v2625_v9  ;;  %v2661_v34 = vpop.f32.mrb[14].mxu1 }
 0x235   : > { %v1787_v44 = vpop.f32.mrb[15].mxu1  ;;  %v1190_v57 = vmul.f32 %v2566_v47, %v2661_v34 }
 0x236   : > { %v1268_v29 = vadd.f32 %v1267_v18, %v1243_v58  ;;  %v1211_v4 = vadd.f32 %v1210_v61, %v1186_v46 }
 0x237   : > { %v1248_v0 = vmul.f32 %v1190_v57, %v2661_v34 }
 0x238   : > { %v1269_v3 = vadd.f32 %v1268_v29, %v1244_v15  ;;  %v1212_v7 = vadd.f32 %v1211_v4, %v2639_v1 }
 0x23a   : > { %v1270_v31 = vadd.f32 %v1269_v3, %v1245_v11  ;;  %v1213_v16 = vadd.f32 %v1212_v7, %v1188_v63  ;;  %v2672_v28 = vpop.f32.mrb[16].mxu1 }
 0x23b   : > { %v1790_v20 = vpop.f32.mrb[17].mxu1  ;;  %v1249_v38 = vmul.f32 %v2672_v28, %v2672_v28 }
 0x23c   : > { %v1271_v19 = vadd.f32 %v1270_v31, %v1246_v60  ;;  %v1214_v10 = vadd.f32 %v1213_v16, %v2656_v50  ;;  %v2677_v55 = vpop.f32.mrb[18].mxu1 }
 0x23d   : > { %v1791_v22 = vpop.f32.mrb[19].mxu1  ;;  %v1192_v5 = vmul.f32 %v2566_v47, %v2677_v55 }
 0x23e   : > { %v1272_v23 = vadd.f32 %v1271_v19, %v1247_v32  ;;  %v1215_v33 = vadd.f32 %v1214_v10, %v1190_v57 }
 0x23f   : > { %v1250_v39 = vmul.f32 %v1192_v5, %v2677_v55 }
 0x240   : > { %v1273_v35 = vadd.f32 %v1272_v23, %v1248_v0  ;;  %v1216_v36 = vadd.f32 %v1215_v33, %v2672_v28 }
 0x242   : > { %v1274_v8 = vadd.f32 %v1273_v35, %v1249_v38  ;;  %v1151_v41 = vpop.f32.mrb[20].mxu1  ;;  %v1217_v25 = vadd.f32 %v1216_v36, %v1192_v5 }
 0x243   : > { %v1794_v42 = vpop.f32.mrb[21].mxu1  ;;  %v1251_v49 = vmul.f32 %v1151_v41, %v1151_v41 }
 0x244   : > { %v1275_v45 = vadd.f32 %v1274_v8, %v1250_v39  ;;  %v1218_v30 = vadd.f32 %v1217_v25, %v1151_v41  ;;  %v1154_v46 = vpop.f32.mrb[22].mxu1 }
 0x245   : > { %v1194_v52 = vmul.f32 %v2566_v47, %v1154_v46  ;;  %v1795_v27 = vpop.f32.mrb[23].mxu1 }
 0x246   : > { %v1276_v53 = vadd.f32 %v1275_v45, %v1251_v49 }
 0x247   : > { %v1219_v58 = vadd.f32 %v1218_v30, %v1194_v52  ;;  %v1252_v18 = vmul.f32 %v1194_v52, %v1154_v46 }
 0x249   : > { %v1220_v61 = vrot.slane %v1219_v58, 4  ;;  %v1277_v44 = vadd.f32 %v1276_v53, %v1252_v18 }
 0x24b   : > { %v1221_v15 = vadd.f32 %v1220_v61, %v1219_v58  ;;  %v1278_v63 = vrot.slane %v1277_v44, 4  ;;  %v1714_v61 = vld [vmem:[%s2945_s3] ss:$0 sm:$0xff] }
 0x24d   : > { %v1222_v29 = vrot.slane %v1221_v15, 2  ;;  %v1279_v4 = vadd.f32 %v1278_v63, %v1277_v44 }
 0x24f   : > { %v1223_v11 = vadd.f32 %v1222_v29, %v1221_v15  ;;  %v1280_v3 = vrot.slane %v1279_v4, 2 }
 0x251   : > { %v1224_v7 = vrot.slane %v1223_v11, 1  ;;  %v1281_v60 = vadd.f32 %v1280_v3, %v1279_v4 }
 0x253   : > { %v1225_v31 = vadd.f32 %v1224_v7, %v1223_v11  ;;  %v1282_v16 = vrot.slane %v1281_v60, 1 }
 0x255   : > { %v1226_v57 = vmul.f32 0.00591716, %v1225_v31  ;;  %v1283_v20 = vadd.f32 %v1282_v16, %v1281_v60 }
 0x257   : > { %v1284_v19 = vmul.f32 0.00591716, %v1283_v20  ;;  %v1285_v47 = vmul.f32 %v1226_v57, %v1226_v57  ;;  %v1288_v10 = vsub.f32 %v2563_v14, %v1226_v57  ;;  %v1289_v32 = vsub.f32 %v2568_v13, %v1226_v57 }
 0x258   : > { %v1290_v22 = vsub.f32 %v2576_v2, %v1226_v57  ;;  %v1291_v23 = vsub.f32 %v2581_v56, %v1226_v57  ;;  %v1292_v0 = vsub.f32 %v2586_v54, %v1226_v57  ;;  %v1293_v33 = vsub.f32 %v2591_v37, %v1226_v57 }
 0x259   : > { %v1286_v5 = vsub.f32 %v1284_v19, %v1285_v47  ;;  %v1294_v35 = vsub.f32 %v2596_v43, %v1226_v57  ;;  %v1295_v36 = vsub.f32 %v2601_v51, %v1226_v57  ;;  %v1296_v38 = vsub.f32 %v2606_v59, %v1226_v57 }
 0x25a   : > { %v1297_v8 = vsub.f32 %v2613_v48, %v1226_v57  ;;  %v1298_v14 = vsub.f32 %v2620_v26, %v1226_v57  ;;  %v1299_v13 = vsub.f32 %v2627_v12, %v1226_v57  ;;  %v1300_v2 = vsub.f32 %v2634_v24, %v1226_v57 }
 0x25b   : > { %v1287_v56 = vmax.f32 %v1286_v5, 0.0  ;;  %v1301_v54 = vsub.f32 %v2641_v21, %v1226_v57  ;;  %v1302_v37 = vsub.f32 %v2611_v62, %v1226_v57  ;;  %v1303_v39 = vsub.f32 %v2617_v40, %v1226_v57 }
 0x25c   : > { %v1304_v43 = vsub.f32 %v2625_v9, %v1226_v57  ;;  %v1305_v51 = vsub.f32 %v2631_v17, %v1226_v57  ;;  %v1306_v59 = vsub.f32 %v2639_v1, %v1226_v57  ;;  %v1307_v48 = vsub.f32 %v2645_v6, %v1226_v57 }
 0x25d   : > { %v1312_v26 = vadd.f32 1e-05, %v1287_v56  ;;  %v1308_v12 = vsub.f32 %v2656_v50, %v1226_v57  ;;  %v1309_v24 = vsub.f32 %v2661_v34, %v1226_v57  ;;  %v1310_v41 = vsub.f32 %v2672_v28, %v1226_v57 }
 0x25e   : > { %v1311_v21 = vsub.f32 %v2677_v55, %v1226_v57 }
 0x25f   : > { %1878 = vrsqrt.f32 %v1312_v26 }
 0x269   : > { %v1879_v62 = vpop.eup %1878 }
 0x26a   : > { %v1314_v40 = vmul.f32 %v1879_v62, %v1288_v10  ;;  %v1315_v25 = vmul.f32 %v1879_v62, %v1289_v32  ;;  %v1316_v9 = vmul.f32 %v1879_v62, %v1290_v22  ;;  %v1317_v42 = vmul.f32 %v1879_v62, %v1291_v23  ;;  %v1715_v23 = vld [vmem:[%s2946_s4] ss:$0 sm:$0xff] }
 0x26b   : > { %v1318_v17 = vmul.f32 %v1879_v62, %v1292_v0  ;;  %v1319_v45 = vmul.f32 %v1879_v62, %v1293_v33  ;;  %v1320_v1 = vmul.f32 %v1879_v62, %v1294_v35  ;;  %v1321_v30 = vmul.f32 %v1879_v62, %v1295_v36 }
 0x26c   : > { %v1322_v6 = vmul.f32 %v1879_v62, %v1296_v38  ;;  %v1323_v49 = vmul.f32 %v1879_v62, %v1297_v8  ;;  %v1324_v46 = vmul.f32 %v1879_v62, %v1298_v14  ;;  %v1325_v50 = vmul.f32 %v1879_v62, %v1299_v13 }
 0x26d   : > { %v1326_v52 = vmul.f32 %v1879_v62, %v1300_v2  ;;  %v1327_v34 = vmul.f32 %v1879_v62, %v1301_v54  ;;  %v1328_v27 = vmul.f32 %v1879_v62, %v1302_v37  ;;  %v1329_v28 = vmul.f32 %v1879_v62, %v1303_v39 }
 0x26e   : > { %v1330_v53 = vmul.f32 %v1879_v62, %v1304_v43  ;;  %v1331_v55 = vmul.f32 %v1879_v62, %v1305_v51  ;;  %v1332_v58 = vmul.f32 %v1879_v62, %v1306_v59  ;;  %v1333_v18 = vmul.f32 %v1879_v62, %v1307_v48 }
 0x26f   : > { %v1334_v44 = vmul.f32 %v1879_v62, %v1308_v12  ;;  %v1335_v15 = vmul.f32 %v1879_v62, %v1309_v24  ;;  %v1336_v63 = vmul.f32 %v1879_v62, %v1310_v41  ;;  %v1337_v29 = vmul.f32 %v1879_v62, %v1311_v21 }
 0x270   : > { %v1345_v4 = vmul.f32 %v1714_v61, %v1314_v40  ;;  %v1346_v11 = vmul.f32 %v1714_v61, %v1315_v25  ;;  %v1347_v3 = vmul.f32 %v1714_v61, %v1316_v9  ;;  %v1348_v7 = vmul.f32 %v1714_v61, %v1317_v42 }
 0x271   : > { %v1349_v60 = vmul.f32 %v1714_v61, %v1318_v17  ;;  %v1350_v31 = vmul.f32 %v1714_v61, %v1319_v45  ;;  %v1351_v16 = vmul.f32 %v1714_v61, %v1320_v1  ;;  %v1352_v57 = vmul.f32 %v1714_v61, %v1321_v30 }
 0x272   : > { %v1353_v20 = vmul.f32 %v1714_v61, %v1322_v6  ;;  %v1354_v19 = vmul.f32 %v1714_v61, %v1323_v49  ;;  %v1355_v47 = vmul.f32 %v1714_v61, %v1324_v46  ;;  %v1356_v10 = vmul.f32 %v1714_v61, %v1325_v50 }
 0x273   : > { %v1357_v32 = vmul.f32 %v1714_v61, %v1326_v52  ;;  %v1358_v22 = vmul.f32 %v1714_v61, %v1327_v34  ;;  %v1359_v0 = vmul.f32 %v1714_v61, %v1328_v27  ;;  %v1360_v33 = vmul.f32 %v1714_v61, %v1329_v28 }
 0x274   : > { %v1361_v5 = vmul.f32 %v1714_v61, %v1330_v53  ;;  %v1362_v35 = vmul.f32 %v1714_v61, %v1331_v55  ;;  %v1363_v36 = vmul.f32 %v1714_v61, %v1332_v58  ;;  %v1364_v38 = vmul.f32 %v1714_v61, %v1333_v18 }
 0x275   : > { %v1365_v8 = vmul.f32 %v1714_v61, %v1334_v44  ;;  %v1366_v14 = vmul.f32 %v1714_v61, %v1335_v15  ;;  %v1367_v13 = vmul.f32 %v1714_v61, %v1336_v63  ;;  %v1368_v2 = vmul.f32 %v1714_v61, %v1337_v29 }
 0x276   : > { %v1376_v56 = vadd.f32 %v1715_v23, %v1345_v4  ;;  %v1377_v54 = vadd.f32 %v1715_v23, %v1346_v11  ;;  %v2717_v37 = vadd.f32 %v1715_v23, %v1347_v3  ;;  %v2719_v39 = vadd.f32 %v1715_v23, %v1348_v7 }
 0x277   : > { %v2721_v43 = vadd.f32 %v1715_v23, %v1349_v60  ;;  %v2723_v51 = vadd.f32 %v1715_v23, %v1350_v31  ;;  %v2725_v59 = vadd.f32 %v1715_v23, %v1351_v16  ;;  %v2727_v48 = vadd.f32 %v1715_v23, %v1352_v57 }
 0x278   : > { %v2729_v26 = vadd.f32 %v1715_v23, %v1353_v20  ;;  %v2731_v12 = vadd.f32 %v1715_v23, %v1354_v19  ;;  %v2733_v24 = vadd.f32 %v1715_v23, %v1355_v47  ;;  %v2735_v41 = vadd.f32 %v1715_v23, %v1356_v10 }
 0x279   : > { %v2737_v21 = vadd.f32 %v1715_v23, %v1357_v32  ;;  %v2739_v62 = vadd.f32 %v1715_v23, %v1358_v22  ;;  %v2741_v40 = vadd.f32 %v1715_v23, %v1359_v0  ;;  %v2743_v25 = vadd.f32 %v1715_v23, %v1360_v33 }
 0x27a   : > { %v2745_v9 = vadd.f32 %v1715_v23, %v1361_v5  ;;  %v2747_v42 = vadd.f32 %v1715_v23, %v1362_v35  ;;  %v2749_v17 = vadd.f32 %v1715_v23, %v1363_v36  ;;  %v2751_v45 = vadd.f32 %v1715_v23, %v1364_v38 }
 0x27b   : > { %v2753_v1 = vadd.f32 %v1715_v23, %v1365_v8  ;;  %v2755_v30 = vadd.f32 %v1715_v23, %v1366_v14  ;;  %v2757_v6 = vadd.f32 %v1715_v23, %v1367_v13  ;;  %v2759_v49 = vadd.f32 %v1715_v23, %v1368_v2 }
 0x27c   : > { %vm1400_vm12 = vcmp.ge.f32.partialorder %v1376_v56, 0.0  ;;  %vm1401_vm13 = vcmp.ge.f32.partialorder %v1377_v54, 0.0  ;;  %vm1402_vm14 = vcmp.ge.f32.partialorder %v2717_v37, 0.0  ;;  %vm1403_vm15 = vcmp.ge.f32.partialorder %v2719_v39, 0.0 }
 0x27d   : > { %vm1404_vm1 = vcmp.ge.f32.partialorder %v2721_v43, 0.0  ;;  %vm1405_vm2 = vcmp.ge.f32.partialorder %v2723_v51, 0.0  ;;  %vm1412_vm9 = vcmp.ge.f32.partialorder %v2737_v21, 0.0  ;;  %vm1413_vm10 = vcmp.ge.f32.partialorder %v2739_v62, 0.0 }
 0x27e   : > { %vm1416_vm3 = vcmp.ge.f32.partialorder %v2745_v9, 0.0  ;;  %vm1417_vm4 = vcmp.ge.f32.partialorder %v2747_v42, 0.0  ;;  %vm1418_vm5 = vcmp.ge.f32.partialorder %v2749_v17, 0.0  ;;  %vm1419_vm6 = vcmp.ge.f32.partialorder %v2751_v45, 0.0 }
 0x27f   : > { %vm1420_vm7 = vcmp.ge.f32.partialorder %v2753_v1, 0.0  ;;  %vm1421_vm8 = vcmp.ge.f32.partialorder %v2755_v30, 0.0  ;;  %v1424_v46 = vmul.f32 0.2, %v1376_v56  ;;  %v1425_v50 = vmul.f32 0.2, %v1377_v54 }
 0x280   : > { %v1426_v52 = vmul.f32 0.2, %v2717_v37  ;;  %vm1422_vm11 = vcmp.ge.f32.partialorder %v2757_v6, 0.0  ;;  %vm1423_vm0 = vcmp.ge.f32.partialorder %v2759_v49, 0.0  ;;  %v1427_v34 = vmul.f32 0.2, %v2719_v39 }
 0x281   : > { %v1428_v27 = vmul.f32 0.2, %v2721_v43  ;;  %v1429_v28 = vmul.f32 0.2, %v2723_v51  ;;  %v1430_v53 = vmul.f32 0.2, %v2725_v59  ;;  %v1448_v18 = vsel %vm1400_vm12, %v1376_v56, %v1424_v46 }
 0x282   : > { %v1431_v55 = vmul.f32 0.2, %v2727_v48  ;;  %v1432_v58 = vmul.f32 0.2, %v2729_v26  ;;  %v1433_v61 = vmul.f32 0.2, %v2731_v12  ;;  %v1449_v63 = vsel %vm1401_vm13, %v1377_v54, %v1425_v50 }
 0x283   : > { %v1434_v44 = vmul.f32 0.2, %v2733_v24  ;;  %v1435_v15 = vmul.f32 0.2, %v2735_v41  ;;  %v1436_v29 = vmul.f32 0.2, %v2737_v21  ;;  %v1450_v3 = vsel %vm1402_vm14, %v2717_v37, %v1426_v52 }
 0x284   : > { %v1437_v4 = vmul.f32 0.2, %v2739_v62  ;;  %v1438_v11 = vmul.f32 0.2, %v2741_v40  ;;  %v1439_v7 = vmul.f32 0.2, %v2743_v25  ;;  %v1451_v16 = vsel %vm1403_vm15, %v2719_v39, %v1427_v34 }
 0x285   : > { %v1440_v60 = vmul.f32 0.2, %v2745_v9  ;;  %v1441_v31 = vmul.f32 0.2, %v2747_v42  ;;  %v1442_v57 = vmul.f32 0.2, %v2749_v17  ;;  %v1452_v47 = vsel %vm1404_vm1, %v2721_v43, %v1428_v27 }
 0x286   : > { %v1443_v20 = vmul.f32 0.2, %v2751_v45  ;;  %v1444_v19 = vmul.f32 0.2, %v2753_v1  ;;  %v1445_v10 = vmul.f32 0.2, %v2755_v30  ;;  %v1453_v23 = vsel %vm1405_vm2, %v2723_v51, %v1429_v28 }
 0x287   : > { %v1446_v32 = vmul.f32 0.2, %v2757_v6  ;;  %v1447_v22 = vmul.f32 0.2, %v2759_v49  ;;  %vm2951_vm12 = vcmp.ge.f32.partialorder %v2725_v59, 0.0  ;;  %vm2952_vm13 = vcmp.ge.f32.partialorder %v2727_v48, 0.0 }
 0x288   : > { %v1454_v0 = vsel %vm2951_vm12, %v2725_v59, %v1430_v53  ;;  %v1455_v33 = vsel %vm2952_vm13, %v2727_v48, %v1431_v55  ;;  %vm2953_vm14 = vcmp.ge.f32.partialorder %v2729_v26, 0.0  ;;  %vm2954_vm15 = vcmp.ge.f32.partialorder %v2731_v12, 0.0 }
 0x289   : > { %v1456_v5 = vsel %vm2953_vm14, %v2729_v26, %v1432_v58  ;;  %v1457_v35 = vsel %vm2954_vm15, %v2731_v12, %v1433_v61  ;;  %vm2955_vm1 = vcmp.ge.f32.partialorder %v2733_v24, 0.0  ;;  %vm2956_vm2 = vcmp.ge.f32.partialorder %v2735_v41, 0.0 }
 0x28a   : > { %v1458_v36 = vsel %vm2955_vm1, %v2733_v24, %v1434_v44  ;;  %v1459_v38 = vsel %vm2956_vm2, %v2735_v41, %v1435_v15  ;;  %v1460_v8 = vsel %vm1412_vm9, %v2737_v21, %v1436_v29  ;;  %v1461_v14 = vsel %vm1413_vm10, %v2739_v62, %v1437_v4 }
 0x28b   : > { %vm2957_vm12 = vcmp.ge.f32.partialorder %v2741_v40, 0.0  ;;  %vm2958_vm13 = vcmp.ge.f32.partialorder %v2743_v25, 0.0  ;;  %v1464_v56 = vsel %vm1416_vm3, %v2745_v9, %v1440_v60  ;;  %v1465_v54 = vsel %vm1417_vm4, %v2747_v42, %v1441_v31 }
 0x28c   : > { %v1462_v13 = vsel %vm2957_vm12, %v2741_v40, %v1438_v11  ;;  %v1463_v2 = vsel %vm2958_vm13, %v2743_v25, %v1439_v7  ;;  %v1466_v37 = vsel %vm1418_vm5, %v2749_v17, %v1442_v57  ;;  %v1467_v39 = vsel %vm1419_vm6, %v2751_v45, %v1443_v20 }
 0x28d   : > { %v1468_v43 = vsel %vm1420_vm7, %v2753_v1, %v1444_v19  ;;  %v1469_v51 = vsel %vm1421_vm8, %v2755_v30, %v1445_v10  ;;  %v1470_v59 = vsel %vm1422_vm11, %v2757_v6, %v1446_v32  ;;  %v1471_v48 = vsel %vm1423_vm0, %v2759_v49, %v1447_v22 }
 0x28e   : > { %v1472_v26 = vadd.f32 %v1450_v3, %v1448_v18  ;;  %v1473_v12 = vadd.f32 %v1451_v16, %v1449_v63  ;;  %v1474_v24 = vadd.f32 %v1454_v0, %v1452_v47  ;;  %v1475_v41 = vadd.f32 %v1455_v33, %v1453_v23 }
 0x28f   : > { %v1476_v21 = vadd.f32 %v1458_v36, %v1456_v5  ;;  %v1477_v62 = vadd.f32 %v1459_v38, %v1457_v35  ;;  %v1478_v40 = vadd.f32 %v1462_v13, %v1460_v8  ;;  %v1479_v25 = vadd.f32 %v1463_v2, %v1461_v14 }
 0x290   : > { %v1480_v9 = vadd.f32 %v1466_v37, %v1464_v56  ;;  %v1481_v42 = vadd.f32 %v1467_v39, %v1465_v54  ;;  %v1482_v17 = vadd.f32 %v1470_v59, %v1468_v43  ;;  %v1483_v45 = vadd.f32 %v1471_v48, %v1469_v51 }
 0x291   : > { %v1497_v1 = vrot.slane %v1472_v26, 1  ;;  %v1498_v30 = vrot.slane %v1473_v12, 1  ;;  %v1500_v46 = vrot.slane %v1474_v24, 1  ;;  %v1502_v6 = vrot.slane %v1475_v41, 1 }
 0x292   : > { %v1504_v50 = vrot.slane %v1476_v21, 1  ;;  %v1506_v52 = vrot.slane %v1477_v62, 1  ;;  %vm2959_vm3 = vcmask 1046528   ;;  %v1508_v34 = vrot.slane %v1478_v40, 1 }
 0x293   : > { %v1499_v49 = vsel %vm2959_vm3, %v1497_v1, %v1498_v30  ;;  %v1510_v27 = vrot.slane %v1479_v25, 1  ;;  %v1512_v28 = vrot.slane %v1480_v9, 1  ;;  %vm2960_vm0 = vmmov %vm2959_vm3  ;;  %v1514_v63 = vrot.slane %v1481_v42, 1 }
 0x294   : > { %v1501_v53 = vsel %vm2960_vm0, %v1498_v30, %v1500_v46  ;;  %vm2961_vm4 = vmmov %vm2960_vm0  ;;  %v1516_v29 = vrot.slane %v1482_v17, 1  ;;  %v1518_v4 = vrot.slane %v1483_v45, 1  ;;  %v1532_v11 = vadd.f32 %v1499_v49, %v1472_v26 }
 0x295   : > { %v1503_v55 = vsel %vm2961_vm4, %v1500_v46, %v1502_v6  ;;  %vm2962_vm5 = vmmov %vm2960_vm0  ;;  %v1533_v3 = vadd.f32 %v1501_v53, %v1473_v12  ;;  %vm1579_vm15 = vcmask 1045504   ;;  %vm1581_vm1 = vcmask 1043456  }
 0x296   : > { %v1505_v58 = vsel %vm2962_vm5, %v1502_v6, %v1504_v50  ;;  %vm2963_vm6 = vmmov %vm2960_vm0  ;;  %v1534_v60 = vadd.f32 %v1503_v55, %v1474_v24  ;;  %1544 = vst [vmem:[#allocation2] sm:$0xff] %v1532_v11  ;;  %v1543_v0 = vadd.f32 %v1518_v4, %v1483_v45  ;;  %vm1583_vm2 = vcmask 1041408  }
 0x297   : > { %v1507_v18 = vsel %vm2963_vm6, %v1504_v50, %v1506_v52  ;;  %vm2964_vm7 = vmmov %vm2960_vm0  ;;  %v1535_v31 = vadd.f32 %v1505_v58, %v1475_v41  ;;  %1545 = vst [vmem:[#allocation2 + $0x8] sm:$0xff] %v1533_v3 }
 0x298   : > { %v1509_v61 = vsel %vm2964_vm7, %v1506_v52, %v1508_v34  ;;  %vm2965_vm8 = vmmov %vm2960_vm0  ;;  %v1536_v16 = vadd.f32 %v1507_v18, %v1476_v21  ;;  %1546 = vst [vmem:[#allocation2 + $0x10] sm:$0xff] %v1534_v60 }
 0x299   : > { %v1511_v44 = vsel %vm2965_vm8, %v1508_v34, %v1510_v27  ;;  %vm2966_vm9 = vmmov %vm2960_vm0  ;;  %v1537_v19 = vadd.f32 %v1509_v61, %v1477_v62  ;;  %1547 = vst [vmem:[#allocation2 + $0x18] sm:$0xff] %v1535_v31 }
 0x29a   : > { %v1513_v15 = vsel %vm2966_vm9, %v1510_v27, %v1512_v28  ;;  %vm2967_vm10 = vmmov %vm2960_vm0  ;;  %v1538_v47 = vadd.f32 %v1511_v44, %v1478_v40  ;;  %1548 = vst [vmem:[#allocation2 + $0x20] sm:$0xff] %v1536_v16 }
 0x29b   : > { %v1515_v7 = vsel %vm2967_vm10, %v1512_v28, %v1514_v63  ;;  %vm2968_vm11 = vmmov %vm2960_vm0  ;;  %v1539_v10 = vadd.f32 %v1513_v15, %v1479_v25  ;;  %1549 = vst [vmem:[#allocation2 + $0x28] sm:$0xff] %v1537_v19 }
 0x29c   : > { %v1517_v57 = vsel %vm2968_vm11, %v1514_v63, %v1516_v29  ;;  %vm2969_vm14 = vmmov %vm2960_vm0  ;;  %v1540_v32 = vadd.f32 %v1515_v7, %v1480_v9  ;;  %1550 = vst [vmem:[#allocation2 + $0x30] sm:$0xff] %v1538_v47 }
 0x29d   : > { %v1519_v20 = vsel %vm2969_vm14, %v1516_v29, %v1518_v4  ;;  %v1541_v22 = vadd.f32 %v1517_v57, %v1481_v42  ;;  %1551 = vst [vmem:[#allocation2 + $0x38] sm:$0xff] %v1539_v10  ;;  %1555 = vst [vmem:[#allocation2 + $0x58] sm:$0x7f] %v1543_v0 }
 0x29e   : > { %v1542_v23 = vadd.f32 %v1519_v20, %v1482_v17  ;;  %1552 = vst [vmem:[#allocation2 + $0x40] sm:$0xff] %v1540_v32  ;;  %v1556_v36 = vld [vmem:[#allocation2] ss:$2 sm:$0x3f] }
 0x29f   : > { %1553 = vst [vmem:[#allocation2 + $0x48] sm:$0xff] %v1541_v22 }
 0x2a0   : > { %1554 = vst [vmem:[#allocation2 + $0x50] sm:$0xff] %v1542_v23  ;;  %v1558_v33 = vld [vmem:[#allocation2 + $0x10] ss:$2 sm:$0x3f] }
 0x2a1   : > { %v1568_v35 = vrot.slane %v1558_v33, 2 }
 0x2a2   : > { %v1560_v5 = vld [vmem:[#allocation2 + $0x20] ss:$2 sm:$0x3f] }
 0x2a3   : > { %v1571_v14 = vrot.slane %v1560_v5, 4  ;;  %v1580_v2 = vsel %vm1579_vm15, %v1556_v36, %v1568_v35 }
 0x2a4   : > { %v1562_v38 = vld [vmem:[#allocation2 + $0x30] ss:$2 sm:$0x3f]  ;;  %v1586_v54 = vmul.f32 0.25, %v1580_v2 }
 0x2a5   : > { %v1574_v13 = vrot.slane %v1562_v38, 6  ;;  %v1582_v39 = vsel %vm1581_vm1, %v1568_v35, %v1571_v14 }
 0x2a6   : > { %v1564_v37 = vld [vmem:[#allocation2 + $0x40] ss:$2 sm:$0x3f]  ;;  %v1587_v59 = vmul.f32 0.25, %v1582_v39  ;;  %1591 = vst [vmem:[%s217_s14] sm:$0xff] %v1586_v54 }
 0x2a7   : > { %v1566_v8 = vld [vmem:[#allocation2 + $0x50] ss:$2 sm:$0x3f]  ;;  %v1584_v43 = vsel %vm1583_vm2, %v1571_v14, %v1574_v13 }
 0x2a8   : > { %v1577_v56 = vrot.slane %v1566_v8, 2  ;;  %v1588_v48 = vmul.f32 0.25, %v1584_v43  ;;  %1592 = vst [vmem:[%s217_s14 + $0x8] sm:$0xff] %v1587_v59 }
 0x2aa   : > { %v1585_v51 = vsel %vm1579_vm15, %v1564_v37, %v1577_v56  ;;  %v1590_v26 = vmul.f32 0.25, %v1577_v56  ;;  %1593 = vst [vmem:[%s217_s14 + $0x10] sm:$0xff] %v1588_v48 }
 0x2ab   : > { %v1589_v12 = vmul.f32 0.25, %v1585_v51 }
 0x2ac   : > { %1595 = vst [vmem:[%s217_s14 + $0x20] sm:$0xf] %v1590_v26 }
 0x2ad   : > { %1594 = vst [vmem:[%s217_s14 + $0x18] sm:$0xff] %v1589_v12 }
 0x2ae   : > { %1893 = shalt.err (!%p1890_p3)
}
 0x2af   : > { %s1894_s6 = scalar_lea.hbm %s2894_s17, 640  ;;  %s1898_s10 = scalar_lea.hbm %s2947_s5, 1280 }
 0x2b0   : > { %p1895_p4 = scmp.ne.s32.totalorder %s2894_s17, %s1894_s6  ;;  %p1899_p9 = scmp.lt.u32.totalorder %s2894_s17, %s2947_s5 }
 0x2b1   : > { %p1900_p10 = scmp.lt.u32.totalorder %s1898_s10, %s1894_s6  ;;  %p1902_p12 = scmp.lt.u32.totalorder %s1894_s6, %s2894_s17 }
 0x2b2   : > { %p1896_p7 = pnand %p1895_p4, %p2022_p5 }
 0x2b3   : > { %p1901_p11 = por %p1900_p10, %p1899_p9 }
 0x2b4   : > { %p1897_p8 = pneg %p1896_p7 }
 0x2b5   : > { %p1903_p13 = por %p1902_p12, %p1901_p11 }
 0x2b7   : > { %p1904_p0 = pnand %p1903_p13, %p1897_p8 }
 0x2b9   : > { %1907 = shalt.err (!%p1904_p0)
}
 0x2ba   : > { %s1953_s13 = smov 128  }
 0x2bb   : > { %1807 = dma.vmem_to_hbm [thread:$0]  (%p2022_p5), %s2896_s15, 640, %s2894_s17, %s2900_s22, %s1953_s13, %s1953_s13, %s1944_s9  }
 0x2bc PF: > { %p1813_p1 = scmp.ge.s32.totalorder %s1942_s21, 2  ;;  %s1625_s14 = sand.u32 1, %s1930_s18  }
 0x2bd   : > { %s1626_s2 = scalar_lea.sflag [#allocation4], %s1625_s14 }
 0x2be   : > { %p1810_p2 = pnand %p1813_p1, %p2026_p6 }
 0x2c0   : > { %1925 = dma.done.wait (!%p1810_p2), %s1626_s2, 640  }
 0x2c1   : > { %1927 = vsyncadd (!%p1810_p2), %s1626_s2, 4294966656  ;;  %p15_p3 = scmp.ge.s32.totalorder %s2009_s23, 4   ;;  %s2970_s18 = smov %s1934_s19 }
 0x2c2   : > { %s2971_s19 = smov %s1938_s20  ;;  %s2972_s20 = smov %s2020_s26 }
 0x2c3   : > { %s2973_s21 = smov %s2009_s23  ;;  %17 = sbr.rel (!%p15_p3) target bundleno = 3 (0x3), region = 80 }
 0x2ca   :  { %1631 = vsyncpa [#allocation4], 1 }
 0x2cb   :  { %1633 = vsyncpa [#allocation4 + $0x1], 1 }

</bundles_post_ra>
